<compile_context>
chip_gen: v6e
topology: v6e:2x2x1
jax: 0.10.0
libtpu: 0.0.40
codegen_flags: <defaults>
</compile_context>

<pallas_src>
import functools

import jax
import jax.numpy as jnp
from jax.experimental import pallas as pl
from jax.experimental.pallas import tpu as pltpu


# --------------------------------------------------------------------------
# Pallas kernel: one FastRGCNConv layer (dense-adjacency, basis-aware)
# --------------------------------------------------------------------------
def rgcn_layer_kernel(adj_ref, xb_ref, comp_ref, x_ref, root_ref, bias_ref,
                      out_ref, acc_ref, *, apply_relu):
    # grid = (row_tiles [parallel], relations [arbitrary, last])
    r = pl.program_id(1)

    # First relation step for this row tile: init accumulator with root transform + bias.
    @pl.when(r == 0)
    def _():
        acc_ref[...] = (
            jnp.dot(x_ref[...], root_ref[...], preferred_element_type=jnp.float32)
            + bias_ref[...]
        )

    # X @ W[r] = sum_b comp[r, b] * XB[b]  -- cheap VPU combine of resident bases.
    c = comp_ref[pl.ds(r, 1), :]                                 # (1, B) f32
    num_bases = xb_ref.shape[0]
    xw = c[:, 0:1] * xb_ref[0].astype(jnp.float32)               # (Npad, H) f32
    for b in range(1, num_bases):
        xw = xw + c[:, b:b + 1] * xb_ref[b].astype(jnp.float32)

    # One MXU matmul per relation: A[r] row-tile @ (X @ W[r]); f32 accumulation.
    acc_ref[...] += jnp.dot(adj_ref[...], xw.astype(jnp.bfloat16),
                            preferred_element_type=jnp.float32)

    # Last relation step: single writeback (fused ReLU for conv1).
    @pl.when(r == pl.num_programs(1) - 1)
    def _():
        res = acc_ref[...]
        if apply_relu:
            res = jnp.maximum(res, 0.0)
        out_ref[...] = res.astype(out_ref.dtype)


def rgcn_layer(x_bf16, adj_bf16, xb_bf16, comp, root_bf16, bias, *,
               tile_m, apply_relu, out_dtype):
    """One FastRGCNConv layer.

    x_bf16:  [Npad, H]  bf16   node features
    adj_bf16:[R, Npad, Npad] bf16  normalized dense adjacency (dst, src)
    xb_bf16: [B, Npad, H] bf16  X @ basis[b]
    comp:    [R, B] f32   basis coefficients
    root_bf16:[H, H] bf16;  bias: [1, H] f32
    """
    n_pad, hidden = x_bf16.shape
    num_rel = adj_bf16.shape[0]
    num_bases = xb_bf16.shape[0]

    kernel = functools.partial(rgcn_layer_kernel, apply_relu=apply_relu)

    return pl.pallas_call(
        kernel,
        out_shape=jax.ShapeDtypeStruct((n_pad, hidden), out_dtype),
        grid_spec=pltpu.PrefetchScalarGridSpec(
            num_scalar_prefetch=0,
            grid=(n_pad // tile_m, num_rel),   # rows (parallel), relations (reduction, last)
            in_specs=[
                # A[r] destination-row tile, streamed per (i, r)
                pl.BlockSpec((pl.Squeezed(), tile_m, n_pad),
                             lambda i, r: (r, i, 0)),
                # XB[b] resident across the whole grid
                pl.BlockSpec((num_bases, n_pad, hidden), lambda i, r: (0, 0, 0)),
                # comp resident (small)
                pl.BlockSpec((num_rel, num_bases), lambda i, r: (0, 0)),
                # X row tile (constant across r -> loaded once per row tile)
                pl.BlockSpec((tile_m, hidden), lambda i, r: (i, 0)),
                # root weight, resident
                pl.BlockSpec((hidden, hidden), lambda i, r: (0, 0)),
                # bias, resident
                pl.BlockSpec((1, hidden), lambda i, r: (0, 0)),
            ],
            out_specs=pl.BlockSpec((tile_m, hidden), lambda i, r: (i, 0)),
            scratch_shapes=[pltpu.VMEM((tile_m, hidden), jnp.float32)],
        ),
        compiler_params=pltpu.CompilerParams(
            dimension_semantics=("parallel", "arbitrary"),
            vmem_limit_bytes=32 * 1024 * 1024,
        ),
    )(adj_bf16, xb_bf16, comp, x_bf16, root_bf16, bias)


# --------------------------------------------------------------------------
# Plain-JAX glue
# --------------------------------------------------------------------------
def build_norm_adjacency(edge_index, edge_type, num_nodes_pad, num_relations):
    """Dense normalized adjacency A[r, dst, src] matching FastRGCNConv 'mean'."""
    src, dst = edge_index[0], edge_index[1]
    adj = jnp.zeros((num_relations, num_nodes_pad, num_nodes_pad), jnp.float32)
    adj = adj.at[edge_type, dst, src].add(1.0)
    count = adj.sum(axis=2, keepdims=True)            # edges into i with rel r
    return adj / jnp.maximum(count, 1.0)


def _round_up(x, m):
    return ((x + m - 1) // m) * m


def _choose_tile_m(num_nodes):
    # Per-generation tuning note: at large N prefer TM~512 on v7x (64 MiB VMEM),
    # TM~1024 on v6e/v5e (raise vmem_limit_bytes accordingly). Demo sizes -> 128.
    return min(512, _round_up(num_nodes, 128))


def rgcn_encoder_forward(params, edge_index, edge_type, num_nodes, num_relations):
    hidden = params["node_emb"].shape[1]
    tile_m = _choose_tile_m(num_nodes)
    n_pad = _round_up(num_nodes, tile_m)

    adj_bf16 = build_norm_adjacency(edge_index, edge_type, n_pad,
                                    num_relations).astype(jnp.bfloat16)

    x0 = jnp.zeros((n_pad, hidden), jnp.float32).at[:num_nodes].set(params["node_emb"])

    # ---- conv1 + fused ReLU ----
    xb1 = jnp.einsum("nh,bho->bno", x0, params["basis1"]).astype(jnp.bfloat16)
    x1 = rgcn_layer(x0.astype(jnp.bfloat16), adj_bf16, xb1, params["comp1"],
                    params["root1"].astype(jnp.bfloat16), params["bias1"],
                    tile_m=tile_m, apply_relu=True, out_dtype=jnp.bfloat16)

    # F.dropout(p=0.2, training=self.training): eval mode -> identity.
    # TODO(synk): training-mode dropout (pltpu.prng_*) not implemented.

    # ---- conv2 ----
    xb2 = jnp.einsum("nh,bho->bno", x1.astype(jnp.float32),
                     params["basis2"]).astype(jnp.bfloat16)
    x2 = rgcn_layer(x1, adj_bf16, xb2, params["comp2"],
                    params["root2"].astype(jnp.bfloat16), params["bias2"],
                    tile_m=tile_m, apply_relu=False, out_dtype=jnp.float32)
    return x2[:num_nodes]


# --------------------------------------------------------------------------
# Parameter init (deterministic, glorot-uniform like reset_parameters)
# --------------------------------------------------------------------------
def glorot(key, shape):
    fan_in, fan_out = shape[-2], shape[-1]
    bound = (6.0 / (fan_in + fan_out)) ** 0.5
    return jax.random.uniform(key, shape, jnp.float32, -bound, bound)


def init_params(key, num_nodes, hidden, num_relations, num_bases):
    ks = jax.random.split(key, 7)
    return {
        "node_emb": glorot(ks[0], (num_nodes, hidden)),
        "basis1": glorot(ks[1], (num_bases, hidden, hidden)),
        "comp1": glorot(ks[2], (num_relations, num_bases)),
        "root1": glorot(ks[3], (hidden, hidden)),
        "bias1": jnp.zeros((1, hidden), jnp.float32),
        "basis2": glorot(ks[4], (num_bases, hidden, hidden)),
        "comp2": glorot(ks[5], (num_relations, num_bases)),
        "root2": glorot(ks[6], (hidden, hidden)),
        "bias2": jnp.zeros((1, hidden), jnp.float32),
    }


# --------------------------------------------------------------------------
# Pure-JAX f32 reference (edge-level gather/scatter, mirrors FastRGCNConv)
# --------------------------------------------------------------------------
def compose_weight(comp, basis):
    return jnp.einsum("rb,bio->rio", comp, basis)


def rgcn_layer_ref(x, edge_index, edge_type, weight, root, bias,
                   num_nodes, num_relations):
    src, dst = edge_index[0], edge_index[1]
    msg = jnp.einsum("eh,eho->eo", x[src], weight[edge_type])
    one_hot = jax.nn.one_hot(edge_type, num_relations, dtype=jnp.float32)
    counts = jnp.zeros((num_nodes, num_relations), jnp.float32).at[dst].add(one_hot)
    norm = 1.0 / jnp.maximum(counts[dst, edge_type], 1.0)
    out = jnp.zeros((num_nodes, weight.shape[-1]), jnp.float32)
    out = out.at[dst].add(norm[:, None] * msg)
    return out + x @ root + bias


def rgcn_encoder_ref(params, edge_index, edge_type, num_nodes, num_relations):
    w1 = compose_weight(params["comp1"], params["basis1"])
    x = jax.nn.relu(rgcn_layer_ref(params["node_emb"], edge_index, edge_type,
                                   w1, params["root1"], params["bias1"],
                                   num_nodes, num_relations))
    w2 = compose_weight(params["comp2"], params["basis2"])
    return rgcn_layer_ref(x, edge_index, edge_type, w2, params["root2"],
                          params["bias2"], num_nodes, num_relations)


# --------------------------------------------------------------------------
if __name__ == "__main__":
    NUM_NODES = 64
    HIDDEN = 128
    NUM_RELATIONS = 4
    NUM_BASES = 3
    NUM_EDGES = 512

    key = jax.random.PRNGKey(0)
    k_param, k_src, k_dst, k_rel = jax.random.split(key, 4)

    params = init_params(k_param, NUM_NODES, HIDDEN, NUM_RELATIONS, NUM_BASES)

    edge_index = jnp.stack([
        jax.random.randint(k_src, (NUM_EDGES,), 0, NUM_NODES, dtype=jnp.int32),
        jax.random.randint(k_dst, (NUM_EDGES,), 0, NUM_NODES, dtype=jnp.int32),
    ])
    edge_type = jax.random.randint(k_rel, (NUM_EDGES,), 0, NUM_RELATIONS,
                                   dtype=jnp.int32)

    fwd = jax.jit(rgcn_encoder_forward, static_argnums=(3, 4))
    out = jax.block_until_ready(fwd(params, edge_index, edge_type,
                                    NUM_NODES, NUM_RELATIONS))

    ref = rgcn_encoder_ref(params, edge_index, edge_type,
                           NUM_NODES, NUM_RELATIONS)
    assert out.shape == (NUM_NODES, HIDDEN) and out.dtype == jnp.float32
    # bf16 adjacency / features with f32 accumulation -> loose but meaningful tolerance.
    assert jnp.allclose(out, ref, atol=3e-2, rtol=3e-2), "mismatch vs reference"

    print("KERNEL_OK")
</pallas_src>

<mosaic_0001>
module attributes {stable_mosaic.version = 11 : i64} {
  func.func private @main(%arg0: i32) attributes {dimension_semantics = [#tpu.dimension_semantics<core_parallel>], iteration_bounds = array<i64: 2>, tpu.core_type = #tpu.core_type<sc_scalar_subcore>, window_params = []} {
    return
  }
}

module attributes {stable_mosaic.version = 11 : i64} {
  func.func private @main(%arg0: i32) attributes {dimension_semantics = [#tpu.dimension_semantics<core_parallel>], iteration_bounds = array<i64: 2>, tpu.core_type = #tpu.core_type<sc_scalar_subcore>, window_params = []} {
    return
  }
}

module attributes {stable_mosaic.version = 11 : i64} {
  func.func @rgcn_layer_kernel(%arg0: i32, %arg1: i32, %arg2: memref<1x128x128xbf16, #tpu.memory_space<vmem>>, %arg3: memref<3x128x128xbf16, #tpu.memory_space<vmem>>, %arg4: memref<4x3xf32, #tpu.memory_space<vmem>>, %arg5: memref<128x128xbf16, #tpu.memory_space<vmem>>, %arg6: memref<128x128xbf16, #tpu.memory_space<vmem>>, %arg7: memref<1x128xf32, #tpu.memory_space<vmem>>, %arg8: memref<128x128xbf16, #tpu.memory_space<vmem>>, %arg9: memref<128x128xf32, #tpu.memory_space<vmem>>) attributes {dimension_semantics = [#tpu.dimension_semantics<parallel>, #tpu.dimension_semantics<arbitrary>], iteration_bounds = array<i64: 1, 4>, scalar_prefetch = 0 : i64, scratch_operands = 1 : i64, tpu.core_type = #tpu.core_type<tc>, window_params = [{transform_indices = @transform_0, window_bounds = array<i64: 1, 128, 128>}, {pipeline_mode = #tpu.pipeline_mode<synchronous>, transform_indices = @transform_1, window_bounds = array<i64: 3, 128, 128>}, {pipeline_mode = #tpu.pipeline_mode<synchronous>, transform_indices = @transform_2, window_bounds = array<i64: 4, 3>}, {transform_indices = @transform_3, window_bounds = array<i64: 128, 128>}, {pipeline_mode = #tpu.pipeline_mode<synchronous>, transform_indices = @transform_4, window_bounds = array<i64: 128, 128>}, {pipeline_mode = #tpu.pipeline_mode<synchronous>, transform_indices = @transform_5, window_bounds = array<i64: 1, 128>}, {transform_indices = @transform_6, window_bounds = array<i64: 128, 128>}]} {
    %c0_i32 = arith.constant 0 : i32
    %0 = arith.cmpi eq, %arg1, %c0_i32 : i32
    %1 = arith.extui %0 : i1 to i32
    %c0_i32_0 = arith.constant 0 : i32
    %2 = arith.cmpi ne, %1, %c0_i32_0 : i32
    scf.if %2 {
      %c0_16 = arith.constant 0 : index
      %c0_17 = arith.constant 0 : index
      %35 = vector.load %arg5[%c0_16, %c0_17] : memref<128x128xbf16, #tpu.memory_space<vmem>>, vector<128x128xbf16>
      %c0_18 = arith.constant 0 : index
      %c0_19 = arith.constant 0 : index
      %36 = vector.load %arg6[%c0_18, %c0_19] : memref<128x128xbf16, #tpu.memory_space<vmem>>, vector<128x128xbf16>
      %cst_20 = arith.constant dense<0.000000e+00> : vector<128x128xf32>
      %37 = tpu.matmul %35, %36, %cst_20 {dimension_numbers = #tpu.dot_dimension_numbers<[1], [0], [0], [1], [0, 0, 1, 1], [], []>} : vector<128x128xbf16>, vector<128x128xbf16>, vector<128x128xf32> -> vector<128x128xf32>
      %c0_21 = arith.constant 0 : index
      %c0_22 = arith.constant 0 : index
      %38 = vector.load %arg7[%c0_21, %c0_22] : memref<1x128xf32, #tpu.memory_space<vmem>>, vector<1x128xf32>
      %39 = vector.broadcast %38 : vector<1x128xf32> to vector<128x128xf32>
      %40 = arith.addf %37, %39 : vector<128x128xf32>
      %c0_23 = arith.constant 0 : index
      %c0_24 = arith.constant 0 : index
      %41 = vector.load %arg9[%c0_23, %c0_24] : memref<128x128xf32, #tpu.memory_space<vmem>>, vector<128x128xf32>
      tpu.vector_store %arg9[%c0_23, %c0_24], %40 {strides = array<i32>} : memref<128x128xf32, #tpu.memory_space<vmem>>, vector<128x128xf32>,
    } else {
    }
    %3 = arith.index_cast %arg1 : i32 to index
    %c0 = arith.constant 0 : index
    %4 = vector.load %arg4[%3, %c0] : memref<4x3xf32, #tpu.memory_space<vmem>>, vector<1x3xf32>
    %5 = vector.extract_strided_slice %4 {offsets = [0, 0], sizes = [1, 1], strides = [1, 1]} : vector<1x3xf32> to vector<1x1xf32>
    %c0_1 = arith.constant 0 : index
    %c0_2 = arith.constant 0 : index
    %c0_3 = arith.constant 0 : index
    %6 = vector.load %arg3[%c0_1, %c0_2, %c0_3] : memref<3x128x128xbf16, #tpu.memory_space<vmem>>, vector<1x128x128xbf16>
    %7 = vector.shape_cast %6 : vector<1x128x128xbf16> to vector<128x128xbf16>
    %8 = arith.extf %7 : vector<128x128xbf16> to vector<128x128xf32>
    %9 = vector.broadcast %5 : vector<1x1xf32> to vector<128x128xf32>
    %10 = arith.mulf %9, %8 : vector<128x128xf32>
    %11 = vector.extract_strided_slice %4 {offsets = [0, 1], sizes = [1, 1], strides = [1, 1]} : vector<1x3xf32> to vector<1x1xf32>
    %c1 = arith.constant 1 : index
    %c0_4 = arith.constant 0 : index
    %c0_5 = arith.constant 0 : index
    %12 = vector.load %arg3[%c1, %c0_4, %c0_5] : memref<3x128x128xbf16, #tpu.memory_space<vmem>>, vector<1x128x128xbf16>
    %13 = vector.shape_cast %12 : vector<1x128x128xbf16> to vector<128x128xbf16>
    %14 = arith.extf %13 : vector<128x128xbf16> to vector<128x128xf32>
    %15 = vector.broadcast %11 : vector<1x1xf32> to vector<128x128xf32>
    %16 = arith.mulf %15, %14 : vector<128x128xf32>
    %17 = arith.addf %10, %16 : vector<128x128xf32>
    %18 = vector.extract_strided_slice %4 {offsets = [0, 2], sizes = [1, 1], strides = [1, 1]} : vector<1x3xf32> to vector<1x1xf32>
    %c2 = arith.constant 2 : index
    %c0_6 = arith.constant 0 : index
    %c0_7 = arith.constant 0 : index
    %19 = vector.load %arg3[%c2, %c0_6, %c0_7] : memref<3x128x128xbf16, #tpu.memory_space<vmem>>, vector<1x128x128xbf16>
    %20 = vector.shape_cast %19 : vector<1x128x128xbf16> to vector<128x128xbf16>
    %21 = arith.extf %20 : vector<128x128xbf16> to vector<128x128xf32>
    %22 = vector.broadcast %18 : vector<1x1xf32> to vector<128x128xf32>
    %23 = arith.mulf %22, %21 : vector<128x128xf32>
    %24 = arith.addf %17, %23 : vector<128x128xf32>
    %c0_8 = arith.constant 0 : index
    %c0_9 = arith.constant 0 : index
    %25 = vector.load %arg9[%c0_8, %c0_9] : memref<128x128xf32, #tpu.memory_space<vmem>>, vector<128x128xf32>
    %c0_10 = arith.constant 0 : index
    %c0_11 = arith.constant 0 : index
    %c0_12 = arith.constant 0 : index
    %26 = vector.load %arg2[%c0_10, %c0_11, %c0_12] : memref<1x128x128xbf16, #tpu.memory_space<vmem>>, vector<1x128x128xbf16>
    %27 = vector.shape_cast %26 : vector<1x128x128xbf16> to vector<128x128xbf16>
    %28 = arith.truncf %24 : vector<128x128xf32> to vector<128x128xbf16>
    %cst = arith.constant dense<0.000000e+00> : vector<128x128xf32>
    %29 = tpu.matmul %27, %28, %cst {dimension_numbers = #tpu.dot_dimension_numbers<[1], [0], [0], [1], [0, 0, 1, 1], [], []>} : vector<128x128xbf16>, vector<128x128xbf16>, vector<128x128xf32> -> vector<128x128xf32>
    %30 = arith.addf %25, %29 : vector<128x128xf32>
    %c0_13 = arith.constant 0 : index
    %c0_14 = arith.constant 0 : index
    %31 = vector.load %arg9[%c0_13, %c0_14] : memref<128x128xf32, #tpu.memory_space<vmem>>, vector<128x128xf32>
    tpu.vector_store %arg9[%c0_13, %c0_14], %30 {strides = array<i32>} : memref<128x128xf32, #tpu.memory_space<vmem>>, vector<128x128xf32>,
    %c3_i32 = arith.constant 3 : i32
    %32 = arith.cmpi eq, %arg1, %c3_i32 : i32
    %33 = arith.extui %32 : i1 to i32
    %c0_i32_15 = arith.constant 0 : i32
    %34 = arith.cmpi ne, %33, %c0_i32_15 : i32
    scf.if %34 {
      %c0_16 = arith.constant 0 : index
      %c0_17 = arith.constant 0 : index
      %35 = vector.load %arg9[%c0_16, %c0_17] : memref<128x128xf32, #tpu.memory_space<vmem>>, vector<128x128xf32>
      %cst_18 = arith.constant 0.000000e+00 : f32
      %36 = vector.broadcast %cst_18 : f32 to vector<128x128xf32>
      %37 = arith.maximumf %35, %36 : vector<128x128xf32>
      %38 = arith.truncf %37 : vector<128x128xf32> to vector<128x128xbf16>
      %c0_19 = arith.constant 0 : index
      %c0_20 = arith.constant 0 : index
      %39 = vector.load %arg8[%c0_19, %c0_20] : memref<128x128xbf16, #tpu.memory_space<vmem>>, vector<128x128xbf16>
      tpu.vector_store %arg8[%c0_19, %c0_20], %38 {strides = array<i32>} : memref<128x128xbf16, #tpu.memory_space<vmem>>, vector<128x128xbf16>,
    } else {
    }
    return
  }
  func.func @transform_0(%arg0: i32, %arg1: i32) -> (i32, i32, i32) {
    %c0_i32 = arith.constant 0 : i32
    %c0_i32_0 = arith.constant 0 : i32
    return %arg1, %arg0, %c0_i32 : i32, i32, i32
  }
  func.func @transform_1(%arg0: i32, %arg1: i32) -> (i32, i32, i32) {
    %c0_i32 = arith.constant 0 : i32
    %c0_i32_0 = arith.constant 0 : i32
    %c0_i32_1 = arith.constant 0 : i32
    %c0_i32_2 = arith.constant 0 : i32
    return %c0_i32, %c0_i32_0, %c0_i32_1 : i32, i32, i32
  }
  func.func @transform_2(%arg0: i32, %arg1: i32) -> (i32, i32) {
    %c0_i32 = arith.constant 0 : i32
    %c0_i32_0 = arith.constant 0 : i32
    %c0_i32_1 = arith.constant 0 : i32
    return %c0_i32, %c0_i32_0 : i32, i32
  }
  func.func @transform_3(%arg0: i32, %arg1: i32) -> (i32, i32) {
    %c0_i32 = arith.constant 0 : i32
    %c0_i32_0 = arith.constant 0 : i32
    return %arg0, %c0_i32 : i32, i32
  }
  func.func @transform_4(%arg0: i32, %arg1: i32) -> (i32, i32) {
    %c0_i32 = arith.constant 0 : i32
    %c0_i32_0 = arith.constant 0 : i32
    %c0_i32_1 = arith.constant 0 : i32
    return %c0_i32, %c0_i32_0 : i32, i32
  }
  func.func @transform_5(%arg0: i32, %arg1: i32) -> (i32, i32) {
    %c0_i32 = arith.constant 0 : i32
    %c0_i32_0 = arith.constant 0 : i32
    %c0_i32_1 = arith.constant 0 : i32
    return %c0_i32, %c0_i32_0 : i32, i32
  }
  func.func @transform_6(%arg0: i32, %arg1: i32) -> (i32, i32) {
    %c0_i32 = arith.constant 0 : i32
    %c0_i32_0 = arith.constant 0 : i32
    return %arg0, %c0_i32 : i32, i32
  }
}

module attributes {stable_mosaic.version = 11 : i64} {
  func.func @rgcn_layer_kernel(%arg0: i32, %arg1: i32, %arg2: memref<1x128x128xbf16, #tpu.memory_space<vmem>>, %arg3: memref<3x128x128xbf16, #tpu.memory_space<vmem>>, %arg4: memref<4x3xf32, #tpu.memory_space<vmem>>, %arg5: memref<128x128xbf16, #tpu.memory_space<vmem>>, %arg6: memref<128x128xbf16, #tpu.memory_space<vmem>>, %arg7: memref<1x128xf32, #tpu.memory_space<vmem>>, %arg8: memref<128x128xf32, #tpu.memory_space<vmem>>, %arg9: memref<128x128xf32, #tpu.memory_space<vmem>>) attributes {dimension_semantics = [#tpu.dimension_semantics<parallel>, #tpu.dimension_semantics<arbitrary>], iteration_bounds = array<i64: 1, 4>, scalar_prefetch = 0 : i64, scratch_operands = 1 : i64, tpu.core_type = #tpu.core_type<tc>, window_params = [{transform_indices = @transform_0, window_bounds = array<i64: 1, 128, 128>}, {pipeline_mode = #tpu.pipeline_mode<synchronous>, transform_indices = @transform_1, window_bounds = array<i64: 3, 128, 128>}, {pipeline_mode = #tpu.pipeline_mode<synchronous>, transform_indices = @transform_2, window_bounds = array<i64: 4, 3>}, {transform_indices = @transform_3, window_bounds = array<i64: 128, 128>}, {pipeline_mode = #tpu.pipeline_mode<synchronous>, transform_indices = @transform_4, window_bounds = array<i64: 128, 128>}, {pipeline_mode = #tpu.pipeline_mode<synchronous>, transform_indices = @transform_5, window_bounds = array<i64: 1, 128>}, {transform_indices = @transform_6, window_bounds = array<i64: 128, 128>}]} {
    %c0_i32 = arith.constant 0 : i32
    %0 = arith.cmpi eq, %arg1, %c0_i32 : i32
    %1 = arith.extui %0 : i1 to i32
    %c0_i32_0 = arith.constant 0 : i32
    %2 = arith.cmpi ne, %1, %c0_i32_0 : i32
    scf.if %2 {
      %c0_16 = arith.constant 0 : index
      %c0_17 = arith.constant 0 : index
      %35 = vector.load %arg5[%c0_16, %c0_17] : memref<128x128xbf16, #tpu.memory_space<vmem>>, vector<128x128xbf16>
      %c0_18 = arith.constant 0 : index
      %c0_19 = arith.constant 0 : index
      %36 = vector.load %arg6[%c0_18, %c0_19] : memref<128x128xbf16, #tpu.memory_space<vmem>>, vector<128x128xbf16>
      %cst_20 = arith.constant dense<0.000000e+00> : vector<128x128xf32>
      %37 = tpu.matmul %35, %36, %cst_20 {dimension_numbers = #tpu.dot_dimension_numbers<[1], [0], [0], [1], [0, 0, 1, 1], [], []>} : vector<128x128xbf16>, vector<128x128xbf16>, vector<128x128xf32> -> vector<128x128xf32>
      %c0_21 = arith.constant 0 : index
      %c0_22 = arith.constant 0 : index
      %38 = vector.load %arg7[%c0_21, %c0_22] : memref<1x128xf32, #tpu.memory_space<vmem>>, vector<1x128xf32>
      %39 = vector.broadcast %38 : vector<1x128xf32> to vector<128x128xf32>
      %40 = arith.addf %37, %39 : vector<128x128xf32>
      %c0_23 = arith.constant 0 : index
      %c0_24 = arith.constant 0 : index
      %41 = vector.load %arg9[%c0_23, %c0_24] : memref<128x128xf32, #tpu.memory_space<vmem>>, vector<128x128xf32>
      tpu.vector_store %arg9[%c0_23, %c0_24], %40 {strides = array<i32>} : memref<128x128xf32, #tpu.memory_space<vmem>>, vector<128x128xf32>,
    } else {
    }
    %3 = arith.index_cast %arg1 : i32 to index
    %c0 = arith.constant 0 : index
    %4 = vector.load %arg4[%3, %c0] : memref<4x3xf32, #tpu.memory_space<vmem>>, vector<1x3xf32>
    %5 = vector.extract_strided_slice %4 {offsets = [0, 0], sizes = [1, 1], strides = [1, 1]} : vector<1x3xf32> to vector<1x1xf32>
    %c0_1 = arith.constant 0 : index
    %c0_2 = arith.constant 0 : index
    %c0_3 = arith.constant 0 : index
    %6 = vector.load %arg3[%c0_1, %c0_2, %c0_3] : memref<3x128x128xbf16, #tpu.memory_space<vmem>>, vector<1x128x128xbf16>
    %7 = vector.shape_cast %6 : vector<1x128x128xbf16> to vector<128x128xbf16>
    %8 = arith.extf %7 : vector<128x128xbf16> to vector<128x128xf32>
    %9 = vector.broadcast %5 : vector<1x1xf32> to vector<128x128xf32>
    %10 = arith.mulf %9, %8 : vector<128x128xf32>
    %11 = vector.extract_strided_slice %4 {offsets = [0, 1], sizes = [1, 1], strides = [1, 1]} : vector<1x3xf32> to vector<1x1xf32>
    %c1 = arith.constant 1 : index
    %c0_4 = arith.constant 0 : index
    %c0_5 = arith.constant 0 : index
    %12 = vector.load %arg3[%c1, %c0_4, %c0_5] : memref<3x128x128xbf16, #tpu.memory_space<vmem>>, vector<1x128x128xbf16>
    %13 = vector.shape_cast %12 : vector<1x128x128xbf16> to vector<128x128xbf16>
    %14 = arith.extf %13 : vector<128x128xbf16> to vector<128x128xf32>
    %15 = vector.broadcast %11 : vector<1x1xf32> to vector<128x128xf32>
    %16 = arith.mulf %15, %14 : vector<128x128xf32>
    %17 = arith.addf %10, %16 : vector<128x128xf32>
    %18 = vector.extract_strided_slice %4 {offsets = [0, 2], sizes = [1, 1], strides = [1, 1]} : vector<1x3xf32> to vector<1x1xf32>
    %c2 = arith.constant 2 : index
    %c0_6 = arith.constant 0 : index
    %c0_7 = arith.constant 0 : index
    %19 = vector.load %arg3[%c2, %c0_6, %c0_7] : memref<3x128x128xbf16, #tpu.memory_space<vmem>>, vector<1x128x128xbf16>
    %20 = vector.shape_cast %19 : vector<1x128x128xbf16> to vector<128x128xbf16>
    %21 = arith.extf %20 : vector<128x128xbf16> to vector<128x128xf32>
    %22 = vector.broadcast %18 : vector<1x1xf32> to vector<128x128xf32>
    %23 = arith.mulf %22, %21 : vector<128x128xf32>
    %24 = arith.addf %17, %23 : vector<128x128xf32>
    %c0_8 = arith.constant 0 : index
    %c0_9 = arith.constant 0 : index
    %25 = vector.load %arg9[%c0_8, %c0_9] : memref<128x128xf32, #tpu.memory_space<vmem>>, vector<128x128xf32>
    %c0_10 = arith.constant 0 : index
    %c0_11 = arith.constant 0 : index
    %c0_12 = arith.constant 0 : index
    %26 = vector.load %arg2[%c0_10, %c0_11, %c0_12] : memref<1x128x128xbf16, #tpu.memory_space<vmem>>, vector<1x128x128xbf16>
    %27 = vector.shape_cast %26 : vector<1x128x128xbf16> to vector<128x128xbf16>
    %28 = arith.truncf %24 : vector<128x128xf32> to vector<128x128xbf16>
    %cst = arith.constant dense<0.000000e+00> : vector<128x128xf32>
    %29 = tpu.matmul %27, %28, %cst {dimension_numbers = #tpu.dot_dimension_numbers<[1], [0], [0], [1], [0, 0, 1, 1], [], []>} : vector<128x128xbf16>, vector<128x128xbf16>, vector<128x128xf32> -> vector<128x128xf32>
    %30 = arith.addf %25, %29 : vector<128x128xf32>
    %c0_13 = arith.constant 0 : index
    %c0_14 = arith.constant 0 : index
    %31 = vector.load %arg9[%c0_13, %c0_14] : memref<128x128xf32, #tpu.memory_space<vmem>>, vector<128x128xf32>
    tpu.vector_store %arg9[%c0_13, %c0_14], %30 {strides = array<i32>} : memref<128x128xf32, #tpu.memory_space<vmem>>, vector<128x128xf32>,
    %c3_i32 = arith.constant 3 : i32
    %32 = arith.cmpi eq, %arg1, %c3_i32 : i32
    %33 = arith.extui %32 : i1 to i32
    %c0_i32_15 = arith.constant 0 : i32
    %34 = arith.cmpi ne, %33, %c0_i32_15 : i32
    scf.if %34 {
      %c0_16 = arith.constant 0 : index
      %c0_17 = arith.constant 0 : index
      %35 = vector.load %arg9[%c0_16, %c0_17] : memref<128x128xf32, #tpu.memory_space<vmem>>, vector<128x128xf32>
      %c0_18 = arith.constant 0 : index
      %c0_19 = arith.constant 0 : index
      %36 = vector.load %arg8[%c0_18, %c0_19] : memref<128x128xf32, #tpu.memory_space<vmem>>, vector<128x128xf32>
      tpu.vector_store %arg8[%c0_18, %c0_19], %35 {strides = array<i32>} : memref<128x128xf32, #tpu.memory_space<vmem>>, vector<128x128xf32>,
    } else {
    }
    return
  }
  func.func @transform_0(%arg0: i32, %arg1: i32) -> (i32, i32, i32) {
    %c0_i32 = arith.constant 0 : i32
    %c0_i32_0 = arith.constant 0 : i32
    return %arg1, %arg0, %c0_i32 : i32, i32, i32
  }
  func.func @transform_1(%arg0: i32, %arg1: i32) -> (i32, i32, i32) {
    %c0_i32 = arith.constant 0 : i32
    %c0_i32_0 = arith.constant 0 : i32
    %c0_i32_1 = arith.constant 0 : i32
    %c0_i32_2 = arith.constant 0 : i32
    return %c0_i32, %c0_i32_0, %c0_i32_1 : i32, i32, i32
  }
  func.func @transform_2(%arg0: i32, %arg1: i32) -> (i32, i32) {
    %c0_i32 = arith.constant 0 : i32
    %c0_i32_0 = arith.constant 0 : i32
    %c0_i32_1 = arith.constant 0 : i32
    return %c0_i32, %c0_i32_0 : i32, i32
  }
  func.func @transform_3(%arg0: i32, %arg1: i32) -> (i32, i32) {
    %c0_i32 = arith.constant 0 : i32
    %c0_i32_0 = arith.constant 0 : i32
    return %arg0, %c0_i32 : i32, i32
  }
  func.func @transform_4(%arg0: i32, %arg1: i32) -> (i32, i32) {
    %c0_i32 = arith.constant 0 : i32
    %c0_i32_0 = arith.constant 0 : i32
    %c0_i32_1 = arith.constant 0 : i32
    return %c0_i32, %c0_i32_0 : i32, i32
  }
  func.func @transform_5(%arg0: i32, %arg1: i32) -> (i32, i32) {
    %c0_i32 = arith.constant 0 : i32
    %c0_i32_0 = arith.constant 0 : i32
    %c0_i32_1 = arith.constant 0 : i32
    return %c0_i32, %c0_i32_0 : i32, i32
  }
  func.func @transform_6(%arg0: i32, %arg1: i32) -> (i32, i32) {
    %c0_i32 = arith.constant 0 : i32
    %c0_i32_0 = arith.constant 0 : i32
    return %arg0, %c0_i32 : i32, i32
  }
}

</mosaic_0001>

<bundles_post_ra>
// kernel: rgcn_encoder_forward.2
= control target key start
LH: loop header
LB: loop body
LE: loop exit
PB: predicated region body
PF: predicated region fallthrough
CT: control target
= control target key end

     0   :  { %s1681_s21 = smov 0   ;;  %s1683_s22 = smov 0   ;;  %s1952_s0 = inlined_call_operand.vmem [shape: bf16[4,128,128], index: 0, kind: input, shape index: {}]   ;;  %s1953_s1 = inlined_call_operand.vmem [shape: bf16[3,128,128], index: 1, kind: input, shape index: {}]   ;;  %s1954_s2 = inlined_call_operand.vmem [shape: f32[4,3], index: 2, kind: input, shape index: {}]   ;;  %s1955_s3 = inlined_call_operand.vmem [shape: bf16[128,128], index: 3, kind: input, shape index: {}]   ;;  %s1956_s4 = inlined_call_operand.vmem [shape: bf16[128,128], index: 4, kind: input, shape index: {}]   ;;  %s1957_s5 = inlined_call_operand.vmem [shape: f32[1,128], index: 5, kind: input, shape index: {}]   ;;  %s1958_s6 = inlined_call_operand.vmem [shape: bf16[128,128], index: 6, kind: output, shape index: {}]  }
   0x1   :  { %s1685_s23 = smov 0  }
   0x2 LB: > { %s25_s24 = sadd.s32 1, %s1638_s22  ;;  %p1171_p0 = scmp.ge.s32.totalorder %s1642_s23, 1  ;;  %s1642_s23 = sphi %s1685_s23, %s16_s23   ;;  %s1638_s22 = sphi %s1683_s22, %s1960_s22   ;;  %s1634_s21 = sphi %s1681_s21, %s1959_s21  }
   0x3   : > { %p26_p1 = scmp.ge.s32.totalorder %s25_s24, 4  ;;  %p242_p2 = scmp.lt.s32.totalorder %s1642_s23, 5 }
   0x5   : > { %s1962_s24 = smov (%p26_p1, %s25_s24), 0  ;;  %p243_p3 = pnand %p1171_p0, %p242_p2 }
   0x6   : > { %p282_p4 = scmp.lt.s32.totalorder (!%p243_p3), %s1634_s21, 3  ;;  %p1174_p5 = scmp.ne.s32.totalorder (!%p243_p3), %s1634_s21, 0 }
   0x7   : > { %246 = sbr.rel (%p243_p3) target bundleno = 693 (0x2b5), region = 44 }
   0xc   : > { %s283_s25 = scalar_select %p282_p4, %s1634_s21, 3 }
   0xd   : > { %307 = sbr.rel (%p1174_p5) target bundleno = 261 (0x105), region = 48 }
   0xe   : > { %s1253_s26 = sshll.u32 %s283_s25, 6 }
   0xf   : > { %s1706_s29 = scalar_lea.vmem %s1952_s0, %s1253_s26 }
  0x12   : > { %v1596_v0 = vld [vmem:[%s1956_s4 + $0x38] sm:$0xff]   ;;  %v1597_v1 = vld [vmem:[%s1956_s4 + $0x30] sm:$0xff]   ;;  %v1598_v2 = vld [vmem:[%s1956_s4 + $0x28] sm:$0xff]  }
  0x13   : > { %1468 = vmatprep.subr.bf16.mxu0 %v1596_v0  ;;  %1532 = vmatprep.subr.bf16.mxu1 %v1596_v0  ;;  %v1599_v3 = vld [vmem:[%s1956_s4 + $0x20] sm:$0xff]   ;;  %v1600_v6 = vld [vmem:[%s1956_s4 + $0x18] sm:$0xff]   ;;  %v1601_v7 = vld [vmem:[%s1956_s4 + $0x10] sm:$0xff]  }
  0x14   : > { %1469 = vmatpush3.bf16.msra.mxu0 %v1596_v0  ;;  %1540 = vmatpush3.bf16.msra.mxu1 %v1596_v0  ;;  %v1604_v4 = vld [vmem:[%s1955_s3] sm:$0xff]   ;;  %v1602_v8 = vld [vmem:[%s1956_s4 + $0x8] sm:$0xff]   ;;  %v1608_v12 = vld [vmem:[%s1955_s3 + $0x10] sm:$0xff]  }
  0x15   : > { %1470 = vmatprep.subr.bf16.mxu0 %v1597_v1  ;;  %1533 = vmatprep.subr.bf16.mxu1 %v1597_v1  ;;  %v1605_v5 = vld [vmem:[%s1955_s3 + $0x20] sm:$0xff]   ;;  %v1606_v10 = vld [vmem:[%s1955_s3 + $0x8] sm:$0xff]   ;;  %v1609_v13 = vld [vmem:[%s1955_s3 + $0x30] sm:$0xff]  }
  0x16   : > { %1484 = vmatprep.mubr.bf16.mxu0 %v1604_v4  ;;  %1492 = vmatprep.mubr.bf16.mxu1 %v1605_v5  ;;  %v1603_v9 = vld [vmem:[%s1956_s4] sm:$0xff]   ;;  %v1607_v11 = vld [vmem:[%s1955_s3 + $0x28] sm:$0xff]   ;;  %v1610_v14 = vld [vmem:[%s1955_s3 + $0x18] sm:$0xff]  }
  0x17   : > { %v1611_v15 = vld [vmem:[%s1955_s3 + $0x38] sm:$0xff]   ;;  %v1175_v16 = vld [vmem:[%s1957_s5] ss:$0 sm:$0xff] }
  0x18   : > { %1471 = vmatpush3.bf16.msra.mxu0 %v1597_v1  ;;  %1541 = vmatpush3.bf16.msra.mxu1 %v1597_v1 }
  0x19   : > { %1472 = vmatprep.subr.bf16.mxu0 %v1598_v2  ;;  %1534 = vmatprep.subr.bf16.mxu1 %v1598_v2 }
  0x1c   : > { %1473 = vmatpush3.bf16.msra.mxu0 %v1598_v2  ;;  %1542 = vmatpush3.bf16.msra.mxu1 %v1598_v2 }
  0x1d   : > { %1474 = vmatprep.subr.bf16.mxu0 %v1599_v3  ;;  %1535 = vmatprep.subr.bf16.mxu1 %v1599_v3 }
  0x20   : > { %1475 = vmatpush3.bf16.msra.mxu0 %v1599_v3  ;;  %1543 = vmatpush3.bf16.msra.mxu1 %v1599_v3 }
  0x21   : > { %1476 = vmatprep.subr.bf16.mxu0 %v1600_v6  ;;  %1536 = vmatprep.subr.bf16.mxu1 %v1600_v6 }
  0x24   : > { %1477 = vmatpush3.bf16.msra.mxu0 %v1600_v6  ;;  %1544 = vmatpush3.bf16.msra.mxu1 %v1600_v6 }
  0x25   : > { %1478 = vmatprep.subr.bf16.mxu0 %v1601_v7  ;;  %1537 = vmatprep.subr.bf16.mxu1 %v1601_v7 }
  0x28   : > { %1479 = vmatpush3.bf16.msra.mxu0 %v1601_v7  ;;  %1545 = vmatpush3.bf16.msra.mxu1 %v1601_v7 }
  0x29   : > { %1480 = vmatprep.subr.bf16.mxu0 %v1602_v8  ;;  %1538 = vmatprep.subr.bf16.mxu1 %v1602_v8 }
  0x2c   : > { %1481 = vmatpush3.bf16.msra.mxu0 %v1602_v8  ;;  %1546 = vmatpush3.bf16.msra.mxu1 %v1602_v8 }
  0x2d   : > { %1482 = vmatprep.subr.bf16.mxu0 %v1603_v9  ;;  %1539 = vmatprep.subr.bf16.mxu1 %v1603_v9 }
  0x30   : > { %1483 = vmatpush3.bf16.msra.mxu0 %v1603_v9  ;;  %1547 = vmatpush3.bf16.msra.mxu1 %v1603_v9 }
  0x33   : > { %1485 = vmatmul.mubr.bf16.vlgmr.msra.gmra.mxu0 %v1606_v10  ;;  %1493 = vmatmul.mubr.bf16.vlgmr.msra.gmra.mxu1 %v1607_v11 }
  0x34   : > { %1488 = vmatprep.mubr.bf16.mxu0 %v1608_v12  ;;  %1496 = vmatprep.mubr.bf16.mxu1 %v1609_v13 }
  0x3b   : > { %1489 = vmatmul.mubr.bf16.gmra.mxu0 %v1610_v14  ;;  %1497 = vmatmul.mubr.bf16.gmra.mxu1 %v1611_v15 }
  0xf3   : > { %v1486_v17 = vpop.f32.mrf.mxu0  ;;  %v1494_v18 = vpop.f32.mrf.mxu1 }
  0xf4   : > { %v486_v19 = vadd.f32 %v1486_v17, %v1175_v16  ;;  %v518_v20 = vadd.f32 %v1494_v18, %v1175_v16 }
  0xf5   : > { %v477_v21 = vpop.f32.mrf.mxu0  ;;  %v509_v22 = vpop.f32.mrf.mxu1 }
  0xf6   : > { %542 = vst [vmem:[#allocation2 + $0x58] sm:$0xff] %v486_v19  ;;  %550 = vst [vmem:[#allocation2 + $0x10] sm:$0xff] %v518_v20  ;;  %v478_v23 = vadd.f32 %v1175_v16, %v477_v21  ;;  %v510_v24 = vadd.f32 %v1175_v16, %v509_v22 }
  0xf7   : > { %v1487_v25 = vpop.f32.mrf.mxu0  ;;  %v1495_v26 = vpop.f32.mrf.mxu1 }
  0xf8   : > { %540 = vst [vmem:[#allocation2 + $0x30] sm:$0xff] %v478_v23  ;;  %548 = vst [vmem:[#allocation2 + $0x40] sm:$0xff] %v510_v24  ;;  %v489_v27 = vadd.f32 %v1487_v25, %v1175_v16  ;;  %v521_v28 = vadd.f32 %v1495_v26, %v1175_v16 }
  0xf9   : > { %v480_v29 = vpop.f32.mrf.mxu0  ;;  %v512_v30 = vpop.f32.mrf.mxu1 }
  0xfa   : > { %543 = vst [vmem:[#allocation2 + $0x18] sm:$0xff] %v489_v27  ;;  %551 = vst [vmem:[#allocation2 + $0x38] sm:$0xff] %v521_v28  ;;  %v481_v31 = vadd.f32 %v1175_v16, %v480_v29  ;;  %v513_v32 = vadd.f32 %v1175_v16, %v512_v30 }
  0xfb   : > { %v1490_v33 = vpop.f32.mrf.mxu0  ;;  %v1498_v34 = vpop.f32.mrf.mxu1 }
  0xfc   : > { %541 = vst [vmem:[#allocation2] sm:$0xff] %v481_v31  ;;  %549 = vst [vmem:[#allocation2 + $0x20] sm:$0xff] %v513_v32  ;;  %v502_v35 = vadd.f32 %v1490_v33, %v1175_v16  ;;  %v534_v36 = vadd.f32 %v1498_v34, %v1175_v16 }
  0xfd   : > { %v493_v37 = vpop.f32.mrf.mxu0  ;;  %v525_v38 = vpop.f32.mrf.mxu1 }
  0xfe   : > { %546 = vst [vmem:[#allocation2 + $0x8] sm:$0xff] %v502_v35  ;;  %554 = vst [vmem:[#allocation2 + $0x78] sm:$0xff] %v534_v36  ;;  %v494_v39 = vadd.f32 %v1175_v16, %v493_v37  ;;  %v526_v40 = vadd.f32 %v1175_v16, %v525_v38 }
  0xff   : > { %v1491_v41 = vpop.f32.mrf.mxu0  ;;  %v1499_v42 = vpop.f32.mrf.mxu1 }
 0x100   : > { %544 = vst [vmem:[#allocation2 + $0x50] sm:$0xff] %v494_v39  ;;  %552 = vst [vmem:[#allocation2 + $0x60] sm:$0xff] %v526_v40  ;;  %v505_v43 = vadd.f32 %v1491_v41, %v1175_v16  ;;  %v537_v44 = vadd.f32 %v1499_v42, %v1175_v16 }
 0x101   : > { %v496_v45 = vpop.f32.mrf.mxu0  ;;  %v528_v46 = vpop.f32.mrf.mxu1 }
 0x102   : > { %547 = vst [vmem:[#allocation2 + $0x48] sm:$0xff] %v505_v43  ;;  %555 = vst [vmem:[#allocation2 + $0x28] sm:$0xff] %v537_v44  ;;  %v497_v47 = vadd.f32 %v1175_v16, %v496_v45  ;;  %v529_v48 = vadd.f32 %v1175_v16, %v528_v46 }
 0x104   : > { %545 = vst [vmem:[#allocation2 + $0x68] sm:$0xff] %v497_v47  ;;  %553 = vst [vmem:[#allocation2 + $0x70] sm:$0xff] %v529_v48 }
 0x105 PF: > { %s556_s27 = scalar_lea.vmem %s1954_s2, %s1634_s21  ;;  %s1644_s28 = smov 127   ;;  %v1612_v50 = vld [vmem:[%s1706_s29] sm:$0xff]   ;;  %v1412_v54 = vld [vmem:[%s1953_s1 + $0x38] sm:$0xff]   ;;  %v1411_v56 = vld [vmem:[%s1953_s1 + $0x30] sm:$0xff]  }
 0x106   : > { %v557_v49 = vld [vmem:[%s556_s27] sm:$0x1]  ;;  %s1645_s30 = smov 126   ;;  %1516 = vmatprep.mubr.bf16.mxu0 %v1612_v50  ;;  %v1420_v55 = vld [vmem:[%s1953_s1 + $0x78] sm:$0xff]   ;;  %v1419_v57 = vld [vmem:[%s1953_s1 + $0x70] sm:$0xff]   ;;  %v1300_v60 = vunpack.c.l.bf16 %v1412_v54  ;;  %v1301_v61 = vunpack.c.h.bf16 %v1412_v54  ;;  %v1296_v2 = vunpack.c.l.bf16 %v1411_v56  ;;  %v1297_v3 = vunpack.c.h.bf16 %v1411_v56  ;;  %p1232_p6 = scmp.ne.s32.totalorder %s1634_s21, 3 }
 0x107   : > { %643 = vrot.lane.b32.xlu0 %v557_v49, %s1644_s28  ;;  %1564 = vpush %v557_v49  ;;  %v1613_v51 = vld [vmem:[%s1706_s29 + $0x20] sm:$0xff]   ;;  %v1410_v58 = vld [vmem:[%s1953_s1 + $0x28] sm:$0xff]   ;;  %v1332_v62 = vunpack.c.l.bf16 %v1420_v55  ;;  %v1333_v0 = vunpack.c.h.bf16 %v1420_v55  ;;  %v1428_v1 = vld [vmem:[%s1953_s1 + $0xb8] sm:$0xff]   ;;  %v1328_v4 = vunpack.c.l.bf16 %v1419_v57  ;;  %v1329_v6 = vunpack.c.h.bf16 %v1419_v57 }
 0x108   : > { %1524 = vmatprep.mubr.bf16.mxu1 %v1613_v51  ;;  %v1418_v59 = vld [vmem:[%s1953_s1 + $0x68] sm:$0xff]   ;;  %v1787_v63 = vld [vmem:[%s1953_s1 + $0x20] sm:$0xff]   ;;  %v1427_v7 = vld [vmem:[%s1953_s1 + $0xb0] sm:$0xff]   ;;  %v1292_v8 = vunpack.c.l.bf16 %v1410_v58  ;;  %v1293_v9 = vunpack.c.h.bf16 %v1410_v58  ;;  %v1364_v18 = vunpack.c.l.bf16 %v1428_v1  ;;  %v1365_v19 = vunpack.c.h.bf16 %v1428_v1 }
 0x109   : > { %v1795_v5 = vld [vmem:[%s1953_s1 + $0x60] sm:$0xff]   ;;  %v1324_v10 = vunpack.c.l.bf16 %v1418_v59  ;;  %v1426_v11 = vld [vmem:[%s1953_s1 + $0xa8] sm:$0xff]   ;;  %v1325_v13 = vunpack.c.h.bf16 %v1418_v59  ;;  %v1288_v14 = vunpack.c.l.bf16 %v1787_v63  ;;  %v1289_v15 = vunpack.c.h.bf16 %v1787_v63  ;;  %v1810_v16 = vld [vmem:[%s1953_s1 + $0x18] sm:$0xff]  }
 0x10a   : > { %v1815_v17 = vld [vmem:[%s1953_s1 + $0x58] sm:$0xff]   ;;  %v1320_v20 = vunpack.c.l.bf16 %v1795_v5  ;;  %v1321_v21 = vunpack.c.h.bf16 %v1795_v5  ;;  %v1360_v22 = vunpack.c.l.bf16 %v1427_v7  ;;  %v1361_v23 = vunpack.c.h.bf16 %v1427_v7  ;;  %v1425_v27 = vld [vmem:[%s1953_s1 + $0xa0] sm:$0xff]   ;;  %v1843_v47 = vld [vmem:[%s1953_s1 + $0x10] sm:$0xff]  }
 0x10b   : > { %713 = vrot.lane.b32.xlu0 %v557_v49, %s1645_s30  ;;  %v1356_v24 = vunpack.c.l.bf16 %v1426_v11  ;;  %v1357_v25 = vunpack.c.h.bf16 %v1426_v11  ;;  %v1284_v28 = vunpack.c.l.bf16 %v1810_v16  ;;  %v1285_v29 = vunpack.c.h.bf16 %v1810_v16  ;;  %v1424_v56 = vld [vmem:[%s1953_s1 + $0x98] sm:$0xff]   ;;  %v1415_v5 = vld [vmem:[%s1953_s1 + $0x50] sm:$0xff]  }
 0x10c   : > { %v1316_v30 = vunpack.c.l.bf16 %v1815_v17  ;;  %v1352_v40 = vunpack.c.l.bf16 %v1425_v27  ;;  %v1353_v41 = vunpack.c.h.bf16 %v1425_v27  ;;  %v1317_v42 = vunpack.c.h.bf16 %v1815_v17 }
 0x10d   : > { %v1280_v59 = vunpack.c.l.bf16 %v1843_v47  ;;  %v1349_v16 = vunpack.c.h.bf16 %v1424_v56 }
 0x138   : > { %s1565_s19 = spop %1564 }
 0x139   : > { %v1803_v12 = vstv %s1565_s19 }
 0x13a   : > { %v608_v26 = vmul.f32 %v1300_v60, %v1803_v12  ;;  %v609_v32 = vmul.f32 %v1301_v61, %v1803_v12  ;;  %v606_v33 = vmul.f32 %v1296_v2, %v1803_v12  ;;  %v607_v34 = vmul.f32 %v1297_v3, %v1803_v12 }
 0x13b   : > { %v604_v39 = vmul.f32 %v1292_v8, %v1803_v12  ;;  %v605_v44 = vmul.f32 %v1293_v9, %v1803_v12  ;;  %v1281_v60 = vunpack.c.h.bf16 %v1843_v47  ;;  %v602_v2 = vmul.f32 %v1288_v14, %v1803_v12  ;;  %v1406_v14 = vld [vmem:[%s1953_s1 + $0x8] sm:$0xff]  }
 0x13c   : > { %v603_v3 = vmul.f32 %v1289_v15, %v1803_v12 }
 0x179   : > { %v644_v52 = vpop.permute.xlu0 %643 }
 0x17a   : > { %1566 = vpush %v644_v52 }
 0x17d   : > { %v714_v53 = vpop.permute.xlu0 %713 }
 0x17e   : > { %1568 = vpush %v714_v53 }
 0x1ab   : > { %s1567_s15 = spop %1566 }
 0x1ac   : > { %v1826_v31 = vstv %s1567_s15 }
 0x1ad   : > { %v662_v35 = vmul.f32 %v1332_v62, %v1826_v31  ;;  %v663_v36 = vmul.f32 %v1333_v0, %v1826_v31  ;;  %v660_v37 = vmul.f32 %v1328_v4, %v1826_v31  ;;  %v661_v38 = vmul.f32 %v1329_v6, %v1826_v31 }
 0x1ae   : > { %v658_v45 = vmul.f32 %v1324_v10, %v1826_v31  ;;  %v659_v46 = vmul.f32 %v1325_v13, %v1826_v31  ;;  %v1348_v4 = vunpack.c.l.bf16 %v1424_v56  ;;  %v656_v8 = vmul.f32 %v1320_v20, %v1826_v31  ;;  %v1423_v20 = vld [vmem:[%s1953_s1 + $0x90] sm:$0xff]  }
 0x1af   : > { %s1569_s18 = spop %1568  ;;  %v678_v43 = vadd.f32 %v662_v35, %v608_v26  ;;  %v679_v49 = vadd.f32 %v663_v36, %v609_v32  ;;  %v676_v50 = vadd.f32 %v660_v37, %v606_v33  ;;  %v677_v51 = vadd.f32 %v661_v38, %v607_v34 }
 0x1b0   : > { %v1845_v48 = vstv %s1569_s18  ;;  %v674_v1 = vadd.f32 %v658_v45, %v604_v39  ;;  %v675_v7 = vadd.f32 %v659_v46, %v605_v44  ;;  %v657_v9 = vmul.f32 %v1321_v21, %v1826_v31  ;;  %v1414_v21 = vld [vmem:[%s1953_s1 + $0x48] sm:$0xff]  }
 0x1b1   : > { %v732_v52 = vmul.f32 %v1364_v18, %v1845_v48  ;;  %v733_v53 = vmul.f32 %v1365_v19, %v1845_v48  ;;  %v730_v54 = vmul.f32 %v1360_v22, %v1845_v48  ;;  %v731_v55 = vmul.f32 %v1361_v23, %v1845_v48 }
 0x1b2   : > { %v728_v57 = vmul.f32 %v1356_v24, %v1845_v48  ;;  %v729_v58 = vmul.f32 %v1357_v25, %v1845_v48  ;;  %v726_v11 = vmul.f32 %v1352_v40, %v1845_v48  ;;  %v600_v13 = vmul.f32 %v1284_v28, %v1803_v12  ;;  %v1422_v40 = vld [vmem:[%s1953_s1 + $0x88] sm:$0xff]  }
 0x1b3   : > { %v748_v61 = vadd.f32 %v732_v52, %v678_v43  ;;  %v749_v62 = vadd.f32 %v733_v53, %v679_v49  ;;  %v746_v63 = vadd.f32 %v730_v54, %v676_v50  ;;  %v747_v0 = vadd.f32 %v731_v55, %v677_v51  ;;  %v1413_v50 = vld [vmem:[%s1953_s1 + $0x40] sm:$0xff]  }
 0x1b4   : > { %v744_v10 = vadd.f32 %v728_v57, %v674_v1  ;;  %v745_v17 = vadd.f32 %v729_v58, %v675_v7  ;;  %v727_v18 = vmul.f32 %v1353_v41, %v1845_v48  ;;  %v1312_v19 = vunpack.c.l.bf16 %v1415_v5 }
 0x1b5   : > { %v789_v6 = vpack.c.bf16 %v749_v62, %v748_v61  ;;  %v788_v15 = vpack.c.bf16 %v747_v0, %v746_v63  ;;  %v601_v22 = vmul.f32 %v1285_v29, %v1803_v12  ;;  %v654_v23 = vmul.f32 %v1316_v30, %v1826_v31  ;;  %v1271_v29 = vld [vmem:[%s1953_s1] sm:$0xff]  }
 0x1b6   : > { %v655_v24 = vmul.f32 %v1317_v42, %v1826_v31  ;;  %v1313_v25 = vunpack.c.h.bf16 %v1415_v5  ;;  %v672_v26 = vadd.f32 %v656_v8, %v602_v2  ;;  %v673_v27 = vadd.f32 %v657_v9, %v603_v3 }
 0x1b7   : > { %1500 = vmatprep.subr.bf16.mxu0 %v789_v6  ;;  %1548 = vmatprep.subr.bf16.mxu1 %v789_v6  ;;  %v1276_v28 = vunpack.c.l.bf16 %v1406_v14  ;;  %v1277_v32 = vunpack.c.h.bf16 %v1406_v14  ;;  %v724_v33 = vmul.f32 %v1348_v4, %v1845_v48  ;;  %v725_v34 = vmul.f32 %v1349_v16, %v1845_v48 }
 0x1b8   : > { %1501 = vmatpush3.bf16.msra.mxu0 %v789_v6  ;;  %1556 = vmatpush3.bf16.msra.mxu1 %v789_v6  ;;  %v1344_v35 = vunpack.c.l.bf16 %v1423_v20  ;;  %v1308_v36 = vunpack.c.l.bf16 %v1414_v21  ;;  %v787_v30 = vpack.c.bf16 %v745_v17, %v744_v10  ;;  %v742_v37 = vadd.f32 %v726_v11, %v672_v26 }
 0x1b9   : > { %1502 = vmatprep.subr.bf16.mxu0 %v788_v15  ;;  %1549 = vmatprep.subr.bf16.mxu1 %v788_v15  ;;  %v743_v38 = vadd.f32 %v727_v18, %v673_v27  ;;  %v1345_v39 = vunpack.c.h.bf16 %v1423_v20  ;;  %v670_v41 = vadd.f32 %v654_v23, %v600_v13  ;;  %v671_v42 = vadd.f32 %v655_v24, %v601_v22  ;;  %v1615_v27 = vld [vmem:[%s1706_s29 + $0x28] sm:$0xff]  }
 0x1ba   : > { %v598_v43 = vmul.f32 %v1280_v59, %v1803_v12  ;;  %v1309_v44 = vunpack.c.h.bf16 %v1414_v21  ;;  %v599_v45 = vmul.f32 %v1281_v60, %v1803_v12  ;;  %v652_v46 = vmul.f32 %v1312_v19, %v1826_v31  ;;  %v1421_v59 = vld [vmem:[%s1953_s1 + $0x80] sm:$0xff]  }
 0x1bb   : > { %v653_v47 = vmul.f32 %v1313_v25, %v1826_v31  ;;  %v1272_v49 = vunpack.c.l.bf16 %v1271_v29  ;;  %v740_v51 = vadd.f32 %v724_v33, %v670_v41  ;;  %v741_v52 = vadd.f32 %v725_v34, %v671_v42  ;;  %v1618_v33 = vld [vmem:[%s1706_s29 + $0x18] sm:$0xff]  }
 0x1bc   : > { %1503 = vmatpush3.bf16.msra.mxu0 %v788_v15  ;;  %1557 = vmatpush3.bf16.msra.mxu1 %v788_v15  ;;  %v1340_v53 = vunpack.c.l.bf16 %v1422_v40  ;;  %v1273_v54 = vunpack.c.h.bf16 %v1271_v29  ;;  %v786_v55 = vpack.c.bf16 %v743_v38, %v742_v37  ;;  %v722_v56 = vmul.f32 %v1344_v35, %v1845_v48  ;;  %v1619_v34 = vld [vmem:[%s1706_s29 + $0x38] sm:$0xff]   ;;  %v750_v37 = vld [vmem:[#allocation2 + $0x30] sm:$0xff]  ;;  %v758_v38 = vld [vmem:[#allocation2 + $0x40] sm:$0xff] }
 0x1bd   : > { %1504 = vmatprep.subr.bf16.mxu0 %v787_v30  ;;  %1550 = vmatprep.subr.bf16.mxu1 %v787_v30  ;;  %v723_v57 = vmul.f32 %v1345_v39, %v1845_v48  ;;  %v1341_v58 = vunpack.c.h.bf16 %v1422_v40  ;;  %v596_v60 = vmul.f32 %v1276_v28, %v1803_v12  ;;  %v597_v61 = vmul.f32 %v1277_v32, %v1803_v12  ;;  %v1616_v28 = vld [vmem:[%s1706_s29 + $0x10] sm:$0xff]   ;;  %v752_v35 = vld [vmem:[#allocation2 + $0x58] sm:$0xff] }
 0x1be   : > { %v650_v62 = vmul.f32 %v1308_v36, %v1826_v31  ;;  %v1304_v63 = vunpack.c.l.bf16 %v1413_v50  ;;  %v668_v0 = vadd.f32 %v652_v46, %v598_v43  ;;  %v669_v1 = vadd.f32 %v653_v47, %v599_v45  ;;  %v1617_v32 = vld [vmem:[%s1706_s29 + $0x30] sm:$0xff]   ;;  %v753_v43 = vld [vmem:[#allocation2 + $0x18] sm:$0xff] }
 0x1bf   : > { %v651_v2 = vmul.f32 %v1309_v44, %v1826_v31  ;;  %v1305_v3 = vunpack.c.h.bf16 %v1413_v50  ;;  %v785_v4 = vpack.c.bf16 %v741_v52, %v740_v51  ;;  %v1336_v5 = vunpack.c.l.bf16 %v1421_v59  ;;  %v760_v36 = vld [vmem:[#allocation2 + $0x10] sm:$0xff]  ;;  %v761_v44 = vld [vmem:[#allocation2 + $0x38] sm:$0xff]  ;;  %v751_v50 = vld [vmem:[#allocation2] sm:$0xff] }
 0x1c0   : > { %1505 = vmatpush3.bf16.msra.mxu0 %v787_v30  ;;  %1558 = vmatpush3.bf16.msra.mxu1 %v787_v30  ;;  %v1337_v6 = vunpack.c.h.bf16 %v1421_v59  ;;  %v738_v7 = vadd.f32 %v722_v56, %v668_v0  ;;  %v739_v8 = vadd.f32 %v723_v57, %v669_v1  ;;  %v720_v9 = vmul.f32 %v1340_v53, %v1845_v48  ;;  %v759_v51 = vld [vmem:[#allocation2 + $0x20] sm:$0xff]  ;;  %v756_v56 = vld [vmem:[#allocation2 + $0x8] sm:$0xff]  ;;  %v764_v57 = vld [vmem:[#allocation2 + $0x78] sm:$0xff] }
 0x1c1   : > { %1506 = vmatprep.subr.bf16.mxu0 %v786_v55  ;;  %1551 = vmatprep.subr.bf16.mxu1 %v786_v55  ;;  %v721_v10 = vmul.f32 %v1341_v58, %v1845_v48  ;;  %v666_v11 = vadd.f32 %v650_v62, %v596_v60  ;;  %v594_v13 = vmul.f32 %v1272_v49, %v1803_v12  ;;  %v754_v62 = vld [vmem:[#allocation2 + $0x50] sm:$0xff] }
 0x1c2   : > { %v595_v16 = vmul.f32 %v1273_v54, %v1803_v12  ;;  %v667_v14 = vadd.f32 %v651_v2, %v597_v61  ;;  %v648_v15 = vmul.f32 %v1304_v63, %v1826_v31  ;;  %v649_v17 = vmul.f32 %v1305_v3, %v1826_v31  ;;  %v762_v63 = vld [vmem:[#allocation2 + $0x60] sm:$0xff] }
 0x1c3   : > { %v718_v18 = vmul.f32 %v1336_v5, %v1845_v48  ;;  %v784_v19 = vpack.c.bf16 %v739_v8, %v738_v7  ;;  %v736_v20 = vadd.f32 %v720_v9, %v666_v11  ;;  %v719_v22 = vmul.f32 %v1337_v6, %v1845_v48  ;;  %v1614_v48 = vld [vmem:[%s1706_s29 + $0x8] sm:$0xff]   ;;  %v763_v11 = vld [vmem:[#allocation2 + $0x70] sm:$0xff] }
 0x1c4   : > { %1507 = vmatpush3.bf16.msra.mxu0 %v786_v55  ;;  %1559 = vmatpush3.bf16.msra.mxu1 %v786_v55  ;;  %v737_v21 = vadd.f32 %v721_v10, %v667_v14  ;;  %v664_v12 = vadd.f32 %v648_v15, %v594_v13  ;;  %v665_v23 = vadd.f32 %v649_v17, %v595_v16  ;;  %v765_v5 = vld [vmem:[#allocation2 + $0x28] sm:$0xff] }
 0x1c5   : > { %1508 = vmatprep.subr.bf16.mxu0 %v785_v4  ;;  %1552 = vmatprep.subr.bf16.mxu1 %v785_v4  ;;  %v755_v10 = vld [vmem:[#allocation2 + $0x68] sm:$0xff] }
 0x1c6   : > { %v783_v24 = vpack.c.bf16 %v737_v21, %v736_v20  ;;  %v734_v25 = vadd.f32 %v718_v18, %v664_v12  ;;  %v735_v31 = vadd.f32 %v719_v22, %v665_v23 }
 0x1c8   : > { %1509 = vmatpush3.bf16.msra.mxu0 %v785_v4  ;;  %1560 = vmatpush3.bf16.msra.mxu1 %v785_v4  ;;  %v782_v26 = vpack.c.bf16 %v735_v31, %v734_v25  ;;  %v757_v4 = vld [vmem:[#allocation2 + $0x48] sm:$0xff] }
 0x1c9   : > { %1510 = vmatprep.subr.bf16.mxu0 %v784_v19  ;;  %1553 = vmatprep.subr.bf16.mxu1 %v784_v19 }
 0x1cc   : > { %1511 = vmatpush3.bf16.msra.mxu0 %v784_v19  ;;  %1561 = vmatpush3.bf16.msra.mxu1 %v784_v19 }
 0x1cd   : > { %1512 = vmatprep.subr.bf16.mxu0 %v783_v24  ;;  %1554 = vmatprep.subr.bf16.mxu1 %v783_v24 }
 0x1d0   : > { %1513 = vmatpush3.bf16.msra.mxu0 %v783_v24  ;;  %1562 = vmatpush3.bf16.msra.mxu1 %v783_v24 }
 0x1d1   : > { %1514 = vmatprep.subr.bf16.mxu0 %v782_v26  ;;  %1555 = vmatprep.subr.bf16.mxu1 %v782_v26 }
 0x1d4   : > { %1515 = vmatpush3.bf16.msra.mxu0 %v782_v26  ;;  %1563 = vmatpush3.bf16.msra.mxu1 %v782_v26 }
 0x1d7   : > { %1517 = vmatmul.mubr.bf16.vlgmr.msra.gmra.mxu0 %v1614_v48  ;;  %1525 = vmatmul.mubr.bf16.vlgmr.msra.gmra.mxu1 %v1615_v27 }
 0x1d8   : > { %1520 = vmatprep.mubr.bf16.mxu0 %v1616_v28  ;;  %1528 = vmatprep.mubr.bf16.mxu1 %v1617_v32 }
 0x1df   : > { %1521 = vmatmul.mubr.bf16.gmra.mxu0 %v1618_v33  ;;  %1529 = vmatmul.mubr.bf16.gmra.mxu1 %v1619_v34 }
 0x297   : > { %v1518_v29 = vpop.f32.mrf.mxu0  ;;  %v1526_v30 = vpop.f32.mrf.mxu1 }
 0x298   : > { %v937_v39 = vadd.f32 %v1518_v29, %v752_v35  ;;  %v945_v40 = vadd.f32 %v1526_v30, %v760_v36 }
 0x299   : > { %v872_v41 = vpop.f32.mrf.mxu0  ;;  %v904_v42 = vpop.f32.mrf.mxu1 }
 0x29a   : > { %953 = vst [vmem:[#allocation2 + $0x58] sm:$0xff] %v937_v39  ;;  %961 = vst [vmem:[#allocation2 + $0x10] sm:$0xff] %v945_v40  ;;  %v935_v45 = vadd.f32 %v872_v41, %v750_v37  ;;  %v943_v46 = vadd.f32 %v904_v42, %v758_v38 }
 0x29b   : > { %v1519_v47 = vpop.f32.mrf.mxu0  ;;  %v1527_v49 = vpop.f32.mrf.mxu1 }
 0x29c   : > { %951 = vst [vmem:[#allocation2 + $0x30] sm:$0xff] %v935_v45  ;;  %959 = vst [vmem:[#allocation2 + $0x40] sm:$0xff] %v943_v46  ;;  %v938_v52 = vadd.f32 %v1519_v47, %v753_v43  ;;  %v946_v53 = vadd.f32 %v1527_v49, %v761_v44 }
 0x29d   : > { %v875_v54 = vpop.f32.mrf.mxu0  ;;  %v907_v55 = vpop.f32.mrf.mxu1 }
 0x29e   : > { %954 = vst [vmem:[#allocation2 + $0x18] sm:$0xff] %v938_v52  ;;  %962 = vst [vmem:[#allocation2 + $0x38] sm:$0xff] %v946_v53  ;;  %v936_v58 = vadd.f32 %v875_v54, %v751_v50  ;;  %v944_v59 = vadd.f32 %v907_v55, %v759_v51 }
 0x29f   : > { %v1522_v60 = vpop.f32.mrf.mxu0  ;;  %v1530_v61 = vpop.f32.mrf.mxu1 }
 0x2a0   : > { %952 = vst [vmem:[#allocation2] sm:$0xff] %v936_v58  ;;  %960 = vst [vmem:[#allocation2 + $0x20] sm:$0xff] %v944_v59  ;;  %v941_v0 = vadd.f32 %v1522_v60, %v756_v56  ;;  %v949_v1 = vadd.f32 %v1530_v61, %v764_v57 }
 0x2a1   : > { %v888_v2 = vpop.f32.mrf.mxu0  ;;  %v920_v3 = vpop.f32.mrf.mxu1 }
 0x2a2   : > { %957 = vst [vmem:[#allocation2 + $0x8] sm:$0xff] %v941_v0  ;;  %965 = vst [vmem:[#allocation2 + $0x78] sm:$0xff] %v949_v1  ;;  %v939_v6 = vadd.f32 %v888_v2, %v754_v62  ;;  %v947_v7 = vadd.f32 %v920_v3, %v762_v63 }
 0x2a3   : > { %v1523_v8 = vpop.f32.mrf.mxu0  ;;  %v1531_v9 = vpop.f32.mrf.mxu1 }
 0x2a4   : > { %955 = vst [vmem:[#allocation2 + $0x50] sm:$0xff] %v939_v6  ;;  %963 = vst [vmem:[#allocation2 + $0x60] sm:$0xff] %v947_v7  ;;  %v942_v13 = vadd.f32 %v1523_v8, %v757_v4  ;;  %v950_v16 = vadd.f32 %v1531_v9, %v765_v5  ;;  %970 = sbr.rel (%p1232_p6) target bundleno = 693 (0x2b5), region = 52 }
 0x2a5   : > { %v891_v14 = vpop.f32.mrf.mxu0  ;;  %v923_v15 = vpop.f32.mrf.mxu1 }
 0x2a6   : > { %958 = vst [vmem:[#allocation2 + $0x48] sm:$0xff] %v942_v13  ;;  %966 = vst [vmem:[#allocation2 + $0x28] sm:$0xff] %v950_v16  ;;  %v940_v17 = vadd.f32 %v891_v14, %v755_v10  ;;  %v948_v18 = vadd.f32 %v923_v15, %v763_v11 }
 0x2a8   : > { %956 = vst [vmem:[#allocation2 + $0x68] sm:$0xff] %v940_v17  ;;  %964 = vst [vmem:[#allocation2 + $0x70] sm:$0xff] %v948_v18 }
 0x2a9   : > { %v971_v19 = vld [vmem:[#allocation2 + $0x30] sm:$0xff]  ;;  %v972_v20 = vld [vmem:[#allocation2] sm:$0xff]  ;;  %v973_v21 = vld [vmem:[#allocation2 + $0x58] sm:$0xff] }
 0x2aa   : > { %v987_v22 = vmax.f32 %v971_v19, 0.0  ;;  %v988_v12 = vmax.f32 %v972_v20, 0.0  ;;  %v974_v23 = vld [vmem:[#allocation2 + $0x18] sm:$0xff]  ;;  %v989_v24 = vmax.f32 %v973_v21, 0.0  ;;  %v977_v28 = vld [vmem:[#allocation2 + $0x8] sm:$0xff]  ;;  %v979_v33 = vld [vmem:[#allocation2 + $0x40] sm:$0xff] }
 0x2ab   : > { %v975_v25 = vld [vmem:[#allocation2 + $0x50] sm:$0xff]  ;;  %v990_v26 = vmax.f32 %v974_v23, 0.0  ;;  %v993_v35 = vmax.f32 %v977_v28, 0.0  ;;  %v980_v29 = vld [vmem:[#allocation2 + $0x20] sm:$0xff]  ;;  %v995_v30 = vmax.f32 %v979_v33, 0.0  ;;  %v982_v38 = vld [vmem:[#allocation2 + $0x38] sm:$0xff] }
 0x2ac   : > { %v991_v48 = vmax.f32 %v975_v25, 0.0  ;;  %v1369_v34 = vpack.c.bf16 %v988_v12, %v987_v22  ;;  %v981_v37 = vld [vmem:[#allocation2 + $0x10] sm:$0xff]  ;;  %v996_v41 = vmax.f32 %v980_v29, 0.0  ;;  %v983_v43 = vld [vmem:[#allocation2 + $0x60] sm:$0xff]  ;;  %v985_v45 = vld [vmem:[#allocation2 + $0x78] sm:$0xff]  ;;  %v998_v47 = vmax.f32 %v982_v38, 0.0 }
 0x2ad   : > { %v978_v32 = vld [vmem:[#allocation2 + $0x48] sm:$0xff]  ;;  %v1374_v39 = vpack.c.bf16 %v990_v26, %v989_v24  ;;  %v997_v42 = vmax.f32 %v981_v37, 0.0  ;;  %v999_v49 = vmax.f32 %v983_v43, 0.0  ;;  %v1001_v53 = vmax.f32 %v985_v45, 0.0 }
 0x2ae   : > { %v994_v36 = vmax.f32 %v978_v32, 0.0  ;;  %1370 = vst [vmem:[%s1958_s6] sm:$0xff] %v1369_v34   ;;  %v986_v51 = vld [vmem:[#allocation2 + $0x28] sm:$0xff]  ;;  %v1389_v52 = vpack.c.bf16 %v996_v41, %v995_v30 }
 0x2af   : > { %v976_v31 = vld [vmem:[#allocation2 + $0x68] sm:$0xff]  ;;  %v984_v44 = vld [vmem:[#allocation2 + $0x70] sm:$0xff]  ;;  %1429 = vst [vmem:[%s1958_s6 + $0x8] sm:$0xff] %v1374_v39   ;;  %v1002_v54 = vmax.f32 %v986_v51, 0.0  ;;  %v1394_v55 = vpack.c.bf16 %v998_v47, %v997_v42 }
 0x2b0   : > { %v992_v27 = vmax.f32 %v976_v31, 0.0  ;;  %v1384_v46 = vpack.c.bf16 %v994_v36, %v993_v35  ;;  %v1000_v50 = vmax.f32 %v984_v44, 0.0  ;;  %1432 = vst [vmem:[%s1958_s6 + $0x20] sm:$0xff] %v1389_v52  }
 0x2b1   : > { %v1404_v57 = vpack.c.bf16 %v1002_v54, %v1001_v53  ;;  %1433 = vst [vmem:[%s1958_s6 + $0x28] sm:$0xff] %v1394_v55  }
 0x2b2   : > { %v1379_v40 = vpack.c.bf16 %v992_v27, %v991_v48  ;;  %1431 = vst [vmem:[%s1958_s6 + $0x18] sm:$0xff] %v1384_v46   ;;  %v1399_v56 = vpack.c.bf16 %v1000_v50, %v999_v49 }
 0x2b3   : > { %1435 = vst [vmem:[%s1958_s6 + $0x38] sm:$0xff] %v1404_v57  }
 0x2b4   : > { %1430 = vst [vmem:[%s1958_s6 + $0x10] sm:$0xff] %v1379_v40   ;;  %1434 = vst [vmem:[%s1958_s6 + $0x30] sm:$0xff] %v1399_v56  }
 0x2b5 PF: > { %s16_s23 = sadd.s32 1, %s1642_s23   ;;  %s1959_s21 = smov %s1638_s22 }
 0x2b6   : > { %p13_p7 = scmp.ge.s32.totalorder %s16_s23, 6   ;;  %s1960_s22 = smov %s1962_s24 }
 0x2b8   :  { %15 = sbr.rel (!%p13_p7) target bundleno = 2 (0x2), region = 88 }

// kernel: rgcn_encoder_forward.3
= control target key start
LH: loop header
LB: loop body
LE: loop exit
PB: predicated region body
PF: predicated region fallthrough
CT: control target
= control target key end

     0   :  { %s1522_s21 = smov 0   ;;  %s1524_s22 = smov 0   ;;  %s1817_s0 = inlined_call_operand.vmem [shape: bf16[4,128,128], index: 0, kind: input, shape index: {}]   ;;  %s1818_s1 = inlined_call_operand.vmem [shape: bf16[3,128,128], index: 1, kind: input, shape index: {}]   ;;  %s1819_s2 = inlined_call_operand.vmem [shape: f32[4,3], index: 2, kind: input, shape index: {}]   ;;  %s1820_s3 = inlined_call_operand.vmem [shape: bf16[128,128], index: 3, kind: input, shape index: {}]   ;;  %s1821_s4 = inlined_call_operand.vmem [shape: bf16[128,128], index: 4, kind: input, shape index: {}]   ;;  %s1822_s5 = inlined_call_operand.vmem [shape: f32[1,128], index: 5, kind: input, shape index: {}]   ;;  %s1823_s6 = inlined_call_operand.vmem [shape: f32[128,128], index: 6, kind: output, shape index: {}]  }
   0x1   :  { %s1526_s23 = smov 0  }
   0x2 LB: > { %s25_s24 = sadd.s32 1, %s1479_s22  ;;  %p1091_p0 = scmp.ge.s32.totalorder %s1483_s23, 1  ;;  %s1483_s23 = sphi %s1526_s23, %s16_s23   ;;  %s1479_s22 = sphi %s1524_s22, %s1825_s22   ;;  %s1475_s21 = sphi %s1522_s21, %s1824_s21  }
   0x3   : > { %p26_p1 = scmp.ge.s32.totalorder %s25_s24, 4  ;;  %p242_p2 = scmp.lt.s32.totalorder %s1483_s23, 5 }
   0x5   : > { %s1827_s24 = smov (%p26_p1, %s25_s24), 0  ;;  %p243_p3 = pnand %p1091_p0, %p242_p2 }
   0x6   : > { %p282_p4 = scmp.lt.s32.totalorder (!%p243_p3), %s1475_s21, 3  ;;  %p1094_p5 = scmp.ne.s32.totalorder (!%p243_p3), %s1475_s21, 0 }
   0x7   : > { %246 = sbr.rel (%p243_p3) target bundleno = 690 (0x2b2), region = 44 }
   0xc   : > { %s283_s25 = scalar_select %p282_p4, %s1475_s21, 3 }
   0xd   : > { %307 = sbr.rel (%p1094_p5) target bundleno = 261 (0x105), region = 48 }
   0xe   : > { %s1157_s26 = sshll.u32 %s283_s25, 6 }
   0xf   : > { %s1547_s29 = scalar_lea.vmem %s1817_s0, %s1157_s26 }
  0x12   : > { %v1437_v0 = vld [vmem:[%s1821_s4 + $0x38] sm:$0xff]   ;;  %v1438_v1 = vld [vmem:[%s1821_s4 + $0x30] sm:$0xff]   ;;  %v1439_v2 = vld [vmem:[%s1821_s4 + $0x28] sm:$0xff]  }
  0x13   : > { %1309 = vmatprep.subr.bf16.mxu0 %v1437_v0  ;;  %1373 = vmatprep.subr.bf16.mxu1 %v1437_v0  ;;  %v1440_v3 = vld [vmem:[%s1821_s4 + $0x20] sm:$0xff]   ;;  %v1441_v6 = vld [vmem:[%s1821_s4 + $0x18] sm:$0xff]   ;;  %v1442_v7 = vld [vmem:[%s1821_s4 + $0x10] sm:$0xff]  }
  0x14   : > { %1310 = vmatpush3.bf16.msra.mxu0 %v1437_v0  ;;  %1381 = vmatpush3.bf16.msra.mxu1 %v1437_v0  ;;  %v1445_v4 = vld [vmem:[%s1820_s3] sm:$0xff]   ;;  %v1443_v8 = vld [vmem:[%s1821_s4 + $0x8] sm:$0xff]   ;;  %v1449_v12 = vld [vmem:[%s1820_s3 + $0x10] sm:$0xff]  }
  0x15   : > { %1311 = vmatprep.subr.bf16.mxu0 %v1438_v1  ;;  %1374 = vmatprep.subr.bf16.mxu1 %v1438_v1  ;;  %v1446_v5 = vld [vmem:[%s1820_s3 + $0x20] sm:$0xff]   ;;  %v1447_v10 = vld [vmem:[%s1820_s3 + $0x8] sm:$0xff]   ;;  %v1450_v13 = vld [vmem:[%s1820_s3 + $0x30] sm:$0xff]  }
  0x16   : > { %1325 = vmatprep.mubr.bf16.mxu0 %v1445_v4  ;;  %1333 = vmatprep.mubr.bf16.mxu1 %v1446_v5  ;;  %v1444_v9 = vld [vmem:[%s1821_s4] sm:$0xff]   ;;  %v1448_v11 = vld [vmem:[%s1820_s3 + $0x28] sm:$0xff]   ;;  %v1451_v14 = vld [vmem:[%s1820_s3 + $0x18] sm:$0xff]  }
  0x17   : > { %v1452_v15 = vld [vmem:[%s1820_s3 + $0x38] sm:$0xff]   ;;  %v1095_v16 = vld [vmem:[%s1822_s5] ss:$0 sm:$0xff] }
  0x18   : > { %1312 = vmatpush3.bf16.msra.mxu0 %v1438_v1  ;;  %1382 = vmatpush3.bf16.msra.mxu1 %v1438_v1 }
  0x19   : > { %1313 = vmatprep.subr.bf16.mxu0 %v1439_v2  ;;  %1375 = vmatprep.subr.bf16.mxu1 %v1439_v2 }
  0x1c   : > { %1314 = vmatpush3.bf16.msra.mxu0 %v1439_v2  ;;  %1383 = vmatpush3.bf16.msra.mxu1 %v1439_v2 }
  0x1d   : > { %1315 = vmatprep.subr.bf16.mxu0 %v1440_v3  ;;  %1376 = vmatprep.subr.bf16.mxu1 %v1440_v3 }
  0x20   : > { %1316 = vmatpush3.bf16.msra.mxu0 %v1440_v3  ;;  %1384 = vmatpush3.bf16.msra.mxu1 %v1440_v3 }
  0x21   : > { %1317 = vmatprep.subr.bf16.mxu0 %v1441_v6  ;;  %1377 = vmatprep.subr.bf16.mxu1 %v1441_v6 }
  0x24   : > { %1318 = vmatpush3.bf16.msra.mxu0 %v1441_v6  ;;  %1385 = vmatpush3.bf16.msra.mxu1 %v1441_v6 }
  0x25   : > { %1319 = vmatprep.subr.bf16.mxu0 %v1442_v7  ;;  %1378 = vmatprep.subr.bf16.mxu1 %v1442_v7 }
  0x28   : > { %1320 = vmatpush3.bf16.msra.mxu0 %v1442_v7  ;;  %1386 = vmatpush3.bf16.msra.mxu1 %v1442_v7 }
  0x29   : > { %1321 = vmatprep.subr.bf16.mxu0 %v1443_v8  ;;  %1379 = vmatprep.subr.bf16.mxu1 %v1443_v8 }
  0x2c   : > { %1322 = vmatpush3.bf16.msra.mxu0 %v1443_v8  ;;  %1387 = vmatpush3.bf16.msra.mxu1 %v1443_v8 }
  0x2d   : > { %1323 = vmatprep.subr.bf16.mxu0 %v1444_v9  ;;  %1380 = vmatprep.subr.bf16.mxu1 %v1444_v9 }
  0x30   : > { %1324 = vmatpush3.bf16.msra.mxu0 %v1444_v9  ;;  %1388 = vmatpush3.bf16.msra.mxu1 %v1444_v9 }
  0x33   : > { %1326 = vmatmul.mubr.bf16.vlgmr.msra.gmra.mxu0 %v1447_v10  ;;  %1334 = vmatmul.mubr.bf16.vlgmr.msra.gmra.mxu1 %v1448_v11 }
  0x34   : > { %1329 = vmatprep.mubr.bf16.mxu0 %v1449_v12  ;;  %1337 = vmatprep.mubr.bf16.mxu1 %v1450_v13 }
  0x3b   : > { %1330 = vmatmul.mubr.bf16.gmra.mxu0 %v1451_v14  ;;  %1338 = vmatmul.mubr.bf16.gmra.mxu1 %v1452_v15 }
  0xf3   : > { %v1327_v17 = vpop.f32.mrf.mxu0  ;;  %v1335_v18 = vpop.f32.mrf.mxu1 }
  0xf4   : > { %v486_v19 = vadd.f32 %v1327_v17, %v1095_v16  ;;  %v518_v20 = vadd.f32 %v1335_v18, %v1095_v16 }
  0xf5   : > { %v477_v21 = vpop.f32.mrf.mxu0  ;;  %v509_v22 = vpop.f32.mrf.mxu1 }
  0xf6   : > { %542 = vst [vmem:[#allocation2 + $0x58] sm:$0xff] %v486_v19  ;;  %550 = vst [vmem:[#allocation2 + $0x10] sm:$0xff] %v518_v20  ;;  %v478_v23 = vadd.f32 %v1095_v16, %v477_v21  ;;  %v510_v24 = vadd.f32 %v1095_v16, %v509_v22 }
  0xf7   : > { %v1328_v25 = vpop.f32.mrf.mxu0  ;;  %v1336_v26 = vpop.f32.mrf.mxu1 }
  0xf8   : > { %540 = vst [vmem:[#allocation2 + $0x30] sm:$0xff] %v478_v23  ;;  %548 = vst [vmem:[#allocation2 + $0x40] sm:$0xff] %v510_v24  ;;  %v489_v27 = vadd.f32 %v1328_v25, %v1095_v16  ;;  %v521_v28 = vadd.f32 %v1336_v26, %v1095_v16 }
  0xf9   : > { %v480_v29 = vpop.f32.mrf.mxu0  ;;  %v512_v30 = vpop.f32.mrf.mxu1 }
  0xfa   : > { %543 = vst [vmem:[#allocation2 + $0x18] sm:$0xff] %v489_v27  ;;  %551 = vst [vmem:[#allocation2 + $0x38] sm:$0xff] %v521_v28  ;;  %v481_v31 = vadd.f32 %v1095_v16, %v480_v29  ;;  %v513_v32 = vadd.f32 %v1095_v16, %v512_v30 }
  0xfb   : > { %v1331_v33 = vpop.f32.mrf.mxu0  ;;  %v1339_v34 = vpop.f32.mrf.mxu1 }
  0xfc   : > { %541 = vst [vmem:[#allocation2] sm:$0xff] %v481_v31  ;;  %549 = vst [vmem:[#allocation2 + $0x20] sm:$0xff] %v513_v32  ;;  %v502_v35 = vadd.f32 %v1331_v33, %v1095_v16  ;;  %v534_v36 = vadd.f32 %v1339_v34, %v1095_v16 }
  0xfd   : > { %v493_v37 = vpop.f32.mrf.mxu0  ;;  %v525_v38 = vpop.f32.mrf.mxu1 }
  0xfe   : > { %546 = vst [vmem:[#allocation2 + $0x8] sm:$0xff] %v502_v35  ;;  %554 = vst [vmem:[#allocation2 + $0x78] sm:$0xff] %v534_v36  ;;  %v494_v39 = vadd.f32 %v1095_v16, %v493_v37  ;;  %v526_v40 = vadd.f32 %v1095_v16, %v525_v38 }
  0xff   : > { %v1332_v41 = vpop.f32.mrf.mxu0  ;;  %v1340_v42 = vpop.f32.mrf.mxu1 }
 0x100   : > { %544 = vst [vmem:[#allocation2 + $0x50] sm:$0xff] %v494_v39  ;;  %552 = vst [vmem:[#allocation2 + $0x60] sm:$0xff] %v526_v40  ;;  %v505_v43 = vadd.f32 %v1332_v41, %v1095_v16  ;;  %v537_v44 = vadd.f32 %v1340_v42, %v1095_v16 }
 0x101   : > { %v496_v45 = vpop.f32.mrf.mxu0  ;;  %v528_v46 = vpop.f32.mrf.mxu1 }
 0x102   : > { %547 = vst [vmem:[#allocation2 + $0x48] sm:$0xff] %v505_v43  ;;  %555 = vst [vmem:[#allocation2 + $0x28] sm:$0xff] %v537_v44  ;;  %v497_v47 = vadd.f32 %v1095_v16, %v496_v45  ;;  %v529_v48 = vadd.f32 %v1095_v16, %v528_v46 }
 0x104   : > { %545 = vst [vmem:[#allocation2 + $0x68] sm:$0xff] %v497_v47  ;;  %553 = vst [vmem:[#allocation2 + $0x70] sm:$0xff] %v529_v48 }
 0x105 PF: > { %s556_s27 = scalar_lea.vmem %s1819_s2, %s1475_s21  ;;  %s1485_s28 = smov 127   ;;  %v1453_v50 = vld [vmem:[%s1547_s29] sm:$0xff]   ;;  %v1260_v54 = vld [vmem:[%s1818_s1 + $0x38] sm:$0xff]   ;;  %v1259_v56 = vld [vmem:[%s1818_s1 + $0x30] sm:$0xff]  }
 0x106   : > { %v557_v49 = vld [vmem:[%s556_s27] sm:$0x1]  ;;  %s1486_s30 = smov 126   ;;  %1357 = vmatprep.mubr.bf16.mxu0 %v1453_v50  ;;  %v1268_v55 = vld [vmem:[%s1818_s1 + $0x78] sm:$0xff]   ;;  %v1267_v57 = vld [vmem:[%s1818_s1 + $0x70] sm:$0xff]   ;;  %v1188_v60 = vunpack.c.l.bf16 %v1260_v54  ;;  %v1189_v61 = vunpack.c.h.bf16 %v1260_v54  ;;  %v1184_v2 = vunpack.c.l.bf16 %v1259_v56  ;;  %v1185_v3 = vunpack.c.h.bf16 %v1259_v56  ;;  %p1152_p6 = scmp.ne.s32.totalorder %s1475_s21, 3 }
 0x107   : > { %643 = vrot.lane.b32.xlu0 %v557_v49, %s1485_s28  ;;  %1405 = vpush %v557_v49  ;;  %v1454_v51 = vld [vmem:[%s1547_s29 + $0x20] sm:$0xff]   ;;  %v1258_v58 = vld [vmem:[%s1818_s1 + $0x28] sm:$0xff]   ;;  %v1220_v62 = vunpack.c.l.bf16 %v1268_v55  ;;  %v1221_v0 = vunpack.c.h.bf16 %v1268_v55  ;;  %v1276_v1 = vld [vmem:[%s1818_s1 + $0xb8] sm:$0xff]   ;;  %v1216_v4 = vunpack.c.l.bf16 %v1267_v57  ;;  %v1217_v6 = vunpack.c.h.bf16 %v1267_v57 }
 0x108   : > { %1365 = vmatprep.mubr.bf16.mxu1 %v1454_v51  ;;  %v1266_v59 = vld [vmem:[%s1818_s1 + $0x68] sm:$0xff]   ;;  %v1628_v63 = vld [vmem:[%s1818_s1 + $0x20] sm:$0xff]   ;;  %v1275_v7 = vld [vmem:[%s1818_s1 + $0xb0] sm:$0xff]   ;;  %v1180_v8 = vunpack.c.l.bf16 %v1258_v58  ;;  %v1181_v9 = vunpack.c.h.bf16 %v1258_v58  ;;  %v1252_v18 = vunpack.c.l.bf16 %v1276_v1  ;;  %v1253_v19 = vunpack.c.h.bf16 %v1276_v1 }
 0x109   : > { %v1636_v5 = vld [vmem:[%s1818_s1 + $0x60] sm:$0xff]   ;;  %v1212_v10 = vunpack.c.l.bf16 %v1266_v59  ;;  %v1274_v11 = vld [vmem:[%s1818_s1 + $0xa8] sm:$0xff]   ;;  %v1213_v13 = vunpack.c.h.bf16 %v1266_v59  ;;  %v1176_v14 = vunpack.c.l.bf16 %v1628_v63  ;;  %v1177_v15 = vunpack.c.h.bf16 %v1628_v63  ;;  %v1651_v16 = vld [vmem:[%s1818_s1 + $0x18] sm:$0xff]  }
 0x10a   : > { %v1656_v17 = vld [vmem:[%s1818_s1 + $0x58] sm:$0xff]   ;;  %v1208_v20 = vunpack.c.l.bf16 %v1636_v5  ;;  %v1209_v21 = vunpack.c.h.bf16 %v1636_v5  ;;  %v1248_v22 = vunpack.c.l.bf16 %v1275_v7  ;;  %v1249_v23 = vunpack.c.h.bf16 %v1275_v7  ;;  %v1273_v27 = vld [vmem:[%s1818_s1 + $0xa0] sm:$0xff]   ;;  %v1684_v47 = vld [vmem:[%s1818_s1 + $0x10] sm:$0xff]  }
 0x10b   : > { %713 = vrot.lane.b32.xlu0 %v557_v49, %s1486_s30  ;;  %v1244_v24 = vunpack.c.l.bf16 %v1274_v11  ;;  %v1245_v25 = vunpack.c.h.bf16 %v1274_v11  ;;  %v1172_v28 = vunpack.c.l.bf16 %v1651_v16  ;;  %v1173_v29 = vunpack.c.h.bf16 %v1651_v16  ;;  %v1272_v56 = vld [vmem:[%s1818_s1 + $0x98] sm:$0xff]   ;;  %v1263_v5 = vld [vmem:[%s1818_s1 + $0x50] sm:$0xff]  }
 0x10c   : > { %v1204_v30 = vunpack.c.l.bf16 %v1656_v17  ;;  %v1240_v40 = vunpack.c.l.bf16 %v1273_v27  ;;  %v1241_v41 = vunpack.c.h.bf16 %v1273_v27  ;;  %v1205_v42 = vunpack.c.h.bf16 %v1656_v17 }
 0x10d   : > { %v1168_v59 = vunpack.c.l.bf16 %v1684_v47  ;;  %v1237_v16 = vunpack.c.h.bf16 %v1272_v56 }
 0x138   : > { %s1406_s19 = spop %1405 }
 0x139   : > { %v1644_v12 = vstv %s1406_s19 }
 0x13a   : > { %v608_v26 = vmul.f32 %v1188_v60, %v1644_v12  ;;  %v609_v32 = vmul.f32 %v1189_v61, %v1644_v12  ;;  %v606_v33 = vmul.f32 %v1184_v2, %v1644_v12  ;;  %v607_v34 = vmul.f32 %v1185_v3, %v1644_v12 }
 0x13b   : > { %v604_v39 = vmul.f32 %v1180_v8, %v1644_v12  ;;  %v605_v44 = vmul.f32 %v1181_v9, %v1644_v12  ;;  %v1169_v60 = vunpack.c.h.bf16 %v1684_v47  ;;  %v602_v2 = vmul.f32 %v1176_v14, %v1644_v12  ;;  %v1254_v14 = vld [vmem:[%s1818_s1 + $0x8] sm:$0xff]  }
 0x13c   : > { %v603_v3 = vmul.f32 %v1177_v15, %v1644_v12 }
 0x179   : > { %v644_v52 = vpop.permute.xlu0 %643 }
 0x17a   : > { %1407 = vpush %v644_v52 }
 0x17d   : > { %v714_v53 = vpop.permute.xlu0 %713 }
 0x17e   : > { %1409 = vpush %v714_v53 }
 0x1ab   : > { %s1408_s15 = spop %1407 }
 0x1ac   : > { %v1667_v31 = vstv %s1408_s15 }
 0x1ad   : > { %v662_v35 = vmul.f32 %v1220_v62, %v1667_v31  ;;  %v663_v36 = vmul.f32 %v1221_v0, %v1667_v31  ;;  %v660_v37 = vmul.f32 %v1216_v4, %v1667_v31  ;;  %v661_v38 = vmul.f32 %v1217_v6, %v1667_v31 }
 0x1ae   : > { %v658_v45 = vmul.f32 %v1212_v10, %v1667_v31  ;;  %v659_v46 = vmul.f32 %v1213_v13, %v1667_v31  ;;  %v1236_v4 = vunpack.c.l.bf16 %v1272_v56  ;;  %v656_v8 = vmul.f32 %v1208_v20, %v1667_v31  ;;  %v1271_v20 = vld [vmem:[%s1818_s1 + $0x90] sm:$0xff]  }
 0x1af   : > { %s1410_s18 = spop %1409  ;;  %v678_v43 = vadd.f32 %v662_v35, %v608_v26  ;;  %v679_v49 = vadd.f32 %v663_v36, %v609_v32  ;;  %v676_v50 = vadd.f32 %v660_v37, %v606_v33  ;;  %v677_v51 = vadd.f32 %v661_v38, %v607_v34 }
 0x1b0   : > { %v1686_v48 = vstv %s1410_s18  ;;  %v674_v1 = vadd.f32 %v658_v45, %v604_v39  ;;  %v675_v7 = vadd.f32 %v659_v46, %v605_v44  ;;  %v657_v9 = vmul.f32 %v1209_v21, %v1667_v31  ;;  %v1262_v21 = vld [vmem:[%s1818_s1 + $0x48] sm:$0xff]  }
 0x1b1   : > { %v732_v52 = vmul.f32 %v1252_v18, %v1686_v48  ;;  %v733_v53 = vmul.f32 %v1253_v19, %v1686_v48  ;;  %v730_v54 = vmul.f32 %v1248_v22, %v1686_v48  ;;  %v731_v55 = vmul.f32 %v1249_v23, %v1686_v48 }
 0x1b2   : > { %v728_v57 = vmul.f32 %v1244_v24, %v1686_v48  ;;  %v729_v58 = vmul.f32 %v1245_v25, %v1686_v48  ;;  %v726_v11 = vmul.f32 %v1240_v40, %v1686_v48  ;;  %v600_v13 = vmul.f32 %v1172_v28, %v1644_v12  ;;  %v1270_v40 = vld [vmem:[%s1818_s1 + $0x88] sm:$0xff]  }
 0x1b3   : > { %v748_v61 = vadd.f32 %v732_v52, %v678_v43  ;;  %v749_v62 = vadd.f32 %v733_v53, %v679_v49  ;;  %v746_v63 = vadd.f32 %v730_v54, %v676_v50  ;;  %v747_v0 = vadd.f32 %v731_v55, %v677_v51  ;;  %v1261_v50 = vld [vmem:[%s1818_s1 + $0x40] sm:$0xff]  }
 0x1b4   : > { %v744_v10 = vadd.f32 %v728_v57, %v674_v1  ;;  %v745_v17 = vadd.f32 %v729_v58, %v675_v7  ;;  %v727_v18 = vmul.f32 %v1241_v41, %v1686_v48  ;;  %v1200_v19 = vunpack.c.l.bf16 %v1263_v5 }
 0x1b5   : > { %v789_v6 = vpack.c.bf16 %v749_v62, %v748_v61  ;;  %v788_v15 = vpack.c.bf16 %v747_v0, %v746_v63  ;;  %v601_v22 = vmul.f32 %v1173_v29, %v1644_v12  ;;  %v654_v23 = vmul.f32 %v1204_v30, %v1667_v31  ;;  %v1159_v29 = vld [vmem:[%s1818_s1] sm:$0xff]  }
 0x1b6   : > { %v655_v24 = vmul.f32 %v1205_v42, %v1667_v31  ;;  %v1201_v25 = vunpack.c.h.bf16 %v1263_v5  ;;  %v672_v26 = vadd.f32 %v656_v8, %v602_v2  ;;  %v673_v27 = vadd.f32 %v657_v9, %v603_v3 }
 0x1b7   : > { %1341 = vmatprep.subr.bf16.mxu0 %v789_v6  ;;  %1389 = vmatprep.subr.bf16.mxu1 %v789_v6  ;;  %v1164_v28 = vunpack.c.l.bf16 %v1254_v14  ;;  %v1165_v32 = vunpack.c.h.bf16 %v1254_v14  ;;  %v724_v33 = vmul.f32 %v1236_v4, %v1686_v48  ;;  %v725_v34 = vmul.f32 %v1237_v16, %v1686_v48 }
 0x1b8   : > { %1342 = vmatpush3.bf16.msra.mxu0 %v789_v6  ;;  %1397 = vmatpush3.bf16.msra.mxu1 %v789_v6  ;;  %v1232_v35 = vunpack.c.l.bf16 %v1271_v20  ;;  %v1196_v36 = vunpack.c.l.bf16 %v1262_v21  ;;  %v787_v30 = vpack.c.bf16 %v745_v17, %v744_v10  ;;  %v742_v37 = vadd.f32 %v726_v11, %v672_v26 }
 0x1b9   : > { %1343 = vmatprep.subr.bf16.mxu0 %v788_v15  ;;  %1390 = vmatprep.subr.bf16.mxu1 %v788_v15  ;;  %v743_v38 = vadd.f32 %v727_v18, %v673_v27  ;;  %v1233_v39 = vunpack.c.h.bf16 %v1271_v20  ;;  %v670_v41 = vadd.f32 %v654_v23, %v600_v13  ;;  %v671_v42 = vadd.f32 %v655_v24, %v601_v22  ;;  %v1456_v27 = vld [vmem:[%s1547_s29 + $0x28] sm:$0xff]  }
 0x1ba   : > { %v598_v43 = vmul.f32 %v1168_v59, %v1644_v12  ;;  %v1197_v44 = vunpack.c.h.bf16 %v1262_v21  ;;  %v599_v45 = vmul.f32 %v1169_v60, %v1644_v12  ;;  %v652_v46 = vmul.f32 %v1200_v19, %v1667_v31  ;;  %v1269_v59 = vld [vmem:[%s1818_s1 + $0x80] sm:$0xff]  }
 0x1bb   : > { %v653_v47 = vmul.f32 %v1201_v25, %v1667_v31  ;;  %v1160_v49 = vunpack.c.l.bf16 %v1159_v29  ;;  %v740_v51 = vadd.f32 %v724_v33, %v670_v41  ;;  %v741_v52 = vadd.f32 %v725_v34, %v671_v42  ;;  %v1459_v33 = vld [vmem:[%s1547_s29 + $0x18] sm:$0xff]  }
 0x1bc   : > { %1344 = vmatpush3.bf16.msra.mxu0 %v788_v15  ;;  %1398 = vmatpush3.bf16.msra.mxu1 %v788_v15  ;;  %v1228_v53 = vunpack.c.l.bf16 %v1270_v40  ;;  %v1161_v54 = vunpack.c.h.bf16 %v1159_v29  ;;  %v786_v55 = vpack.c.bf16 %v743_v38, %v742_v37  ;;  %v722_v56 = vmul.f32 %v1232_v35, %v1686_v48  ;;  %v1460_v34 = vld [vmem:[%s1547_s29 + $0x38] sm:$0xff]   ;;  %v750_v37 = vld [vmem:[#allocation2 + $0x30] sm:$0xff]  ;;  %v758_v38 = vld [vmem:[#allocation2 + $0x40] sm:$0xff] }
 0x1bd   : > { %1345 = vmatprep.subr.bf16.mxu0 %v787_v30  ;;  %1391 = vmatprep.subr.bf16.mxu1 %v787_v30  ;;  %v723_v57 = vmul.f32 %v1233_v39, %v1686_v48  ;;  %v1229_v58 = vunpack.c.h.bf16 %v1270_v40  ;;  %v596_v60 = vmul.f32 %v1164_v28, %v1644_v12  ;;  %v597_v61 = vmul.f32 %v1165_v32, %v1644_v12  ;;  %v1457_v28 = vld [vmem:[%s1547_s29 + $0x10] sm:$0xff]   ;;  %v752_v35 = vld [vmem:[#allocation2 + $0x58] sm:$0xff] }
 0x1be   : > { %v650_v62 = vmul.f32 %v1196_v36, %v1667_v31  ;;  %v1192_v63 = vunpack.c.l.bf16 %v1261_v50  ;;  %v668_v0 = vadd.f32 %v652_v46, %v598_v43  ;;  %v669_v1 = vadd.f32 %v653_v47, %v599_v45  ;;  %v1458_v32 = vld [vmem:[%s1547_s29 + $0x30] sm:$0xff]   ;;  %v753_v43 = vld [vmem:[#allocation2 + $0x18] sm:$0xff] }
 0x1bf   : > { %v651_v2 = vmul.f32 %v1197_v44, %v1667_v31  ;;  %v1193_v3 = vunpack.c.h.bf16 %v1261_v50  ;;  %v785_v4 = vpack.c.bf16 %v741_v52, %v740_v51  ;;  %v1224_v5 = vunpack.c.l.bf16 %v1269_v59  ;;  %v760_v36 = vld [vmem:[#allocation2 + $0x10] sm:$0xff]  ;;  %v761_v44 = vld [vmem:[#allocation2 + $0x38] sm:$0xff]  ;;  %v751_v50 = vld [vmem:[#allocation2] sm:$0xff] }
 0x1c0   : > { %1346 = vmatpush3.bf16.msra.mxu0 %v787_v30  ;;  %1399 = vmatpush3.bf16.msra.mxu1 %v787_v30  ;;  %v1225_v6 = vunpack.c.h.bf16 %v1269_v59  ;;  %v738_v7 = vadd.f32 %v722_v56, %v668_v0  ;;  %v739_v8 = vadd.f32 %v723_v57, %v669_v1  ;;  %v720_v9 = vmul.f32 %v1228_v53, %v1686_v48  ;;  %v759_v51 = vld [vmem:[#allocation2 + $0x20] sm:$0xff]  ;;  %v756_v56 = vld [vmem:[#allocation2 + $0x8] sm:$0xff]  ;;  %v764_v57 = vld [vmem:[#allocation2 + $0x78] sm:$0xff] }
 0x1c1   : > { %1347 = vmatprep.subr.bf16.mxu0 %v786_v55  ;;  %1392 = vmatprep.subr.bf16.mxu1 %v786_v55  ;;  %v721_v10 = vmul.f32 %v1229_v58, %v1686_v48  ;;  %v666_v11 = vadd.f32 %v650_v62, %v596_v60  ;;  %v594_v13 = vmul.f32 %v1160_v49, %v1644_v12  ;;  %v754_v62 = vld [vmem:[#allocation2 + $0x50] sm:$0xff] }
 0x1c2   : > { %v595_v16 = vmul.f32 %v1161_v54, %v1644_v12  ;;  %v667_v14 = vadd.f32 %v651_v2, %v597_v61  ;;  %v648_v15 = vmul.f32 %v1192_v63, %v1667_v31  ;;  %v649_v17 = vmul.f32 %v1193_v3, %v1667_v31  ;;  %v762_v63 = vld [vmem:[#allocation2 + $0x60] sm:$0xff] }
 0x1c3   : > { %v718_v18 = vmul.f32 %v1224_v5, %v1686_v48  ;;  %v784_v19 = vpack.c.bf16 %v739_v8, %v738_v7  ;;  %v736_v20 = vadd.f32 %v720_v9, %v666_v11  ;;  %v719_v22 = vmul.f32 %v1225_v6, %v1686_v48  ;;  %v1455_v48 = vld [vmem:[%s1547_s29 + $0x8] sm:$0xff]   ;;  %v763_v11 = vld [vmem:[#allocation2 + $0x70] sm:$0xff] }
 0x1c4   : > { %1348 = vmatpush3.bf16.msra.mxu0 %v786_v55  ;;  %1400 = vmatpush3.bf16.msra.mxu1 %v786_v55  ;;  %v737_v21 = vadd.f32 %v721_v10, %v667_v14  ;;  %v664_v12 = vadd.f32 %v648_v15, %v594_v13  ;;  %v665_v23 = vadd.f32 %v649_v17, %v595_v16  ;;  %v765_v5 = vld [vmem:[#allocation2 + $0x28] sm:$0xff] }
 0x1c5   : > { %1349 = vmatprep.subr.bf16.mxu0 %v785_v4  ;;  %1393 = vmatprep.subr.bf16.mxu1 %v785_v4  ;;  %v755_v10 = vld [vmem:[#allocation2 + $0x68] sm:$0xff] }
 0x1c6   : > { %v783_v24 = vpack.c.bf16 %v737_v21, %v736_v20  ;;  %v734_v25 = vadd.f32 %v718_v18, %v664_v12  ;;  %v735_v31 = vadd.f32 %v719_v22, %v665_v23 }
 0x1c8   : > { %1350 = vmatpush3.bf16.msra.mxu0 %v785_v4  ;;  %1401 = vmatpush3.bf16.msra.mxu1 %v785_v4  ;;  %v782_v26 = vpack.c.bf16 %v735_v31, %v734_v25  ;;  %v757_v4 = vld [vmem:[#allocation2 + $0x48] sm:$0xff] }
 0x1c9   : > { %1351 = vmatprep.subr.bf16.mxu0 %v784_v19  ;;  %1394 = vmatprep.subr.bf16.mxu1 %v784_v19 }
 0x1cc   : > { %1352 = vmatpush3.bf16.msra.mxu0 %v784_v19  ;;  %1402 = vmatpush3.bf16.msra.mxu1 %v784_v19 }
 0x1cd   : > { %1353 = vmatprep.subr.bf16.mxu0 %v783_v24  ;;  %1395 = vmatprep.subr.bf16.mxu1 %v783_v24 }
 0x1d0   : > { %1354 = vmatpush3.bf16.msra.mxu0 %v783_v24  ;;  %1403 = vmatpush3.bf16.msra.mxu1 %v783_v24 }
 0x1d1   : > { %1355 = vmatprep.subr.bf16.mxu0 %v782_v26  ;;  %1396 = vmatprep.subr.bf16.mxu1 %v782_v26 }
 0x1d4   : > { %1356 = vmatpush3.bf16.msra.mxu0 %v782_v26  ;;  %1404 = vmatpush3.bf16.msra.mxu1 %v782_v26 }
 0x1d7   : > { %1358 = vmatmul.mubr.bf16.vlgmr.msra.gmra.mxu0 %v1455_v48  ;;  %1366 = vmatmul.mubr.bf16.vlgmr.msra.gmra.mxu1 %v1456_v27 }
 0x1d8   : > { %1361 = vmatprep.mubr.bf16.mxu0 %v1457_v28  ;;  %1369 = vmatprep.mubr.bf16.mxu1 %v1458_v32 }
 0x1df   : > { %1362 = vmatmul.mubr.bf16.gmra.mxu0 %v1459_v33  ;;  %1370 = vmatmul.mubr.bf16.gmra.mxu1 %v1460_v34 }
 0x297   : > { %v1359_v29 = vpop.f32.mrf.mxu0  ;;  %v1367_v30 = vpop.f32.mrf.mxu1 }
 0x298   : > { %v937_v39 = vadd.f32 %v1359_v29, %v752_v35  ;;  %v945_v40 = vadd.f32 %v1367_v30, %v760_v36 }
 0x299   : > { %v872_v41 = vpop.f32.mrf.mxu0  ;;  %v904_v42 = vpop.f32.mrf.mxu1 }
 0x29a   : > { %953 = vst [vmem:[#allocation2 + $0x58] sm:$0xff] %v937_v39  ;;  %961 = vst [vmem:[#allocation2 + $0x10] sm:$0xff] %v945_v40  ;;  %v935_v45 = vadd.f32 %v872_v41, %v750_v37  ;;  %v943_v46 = vadd.f32 %v904_v42, %v758_v38 }
 0x29b   : > { %v1360_v47 = vpop.f32.mrf.mxu0  ;;  %v1368_v49 = vpop.f32.mrf.mxu1 }
 0x29c   : > { %951 = vst [vmem:[#allocation2 + $0x30] sm:$0xff] %v935_v45  ;;  %959 = vst [vmem:[#allocation2 + $0x40] sm:$0xff] %v943_v46  ;;  %v938_v52 = vadd.f32 %v1360_v47, %v753_v43  ;;  %v946_v53 = vadd.f32 %v1368_v49, %v761_v44 }
 0x29d   : > { %v875_v54 = vpop.f32.mrf.mxu0  ;;  %v907_v55 = vpop.f32.mrf.mxu1 }
 0x29e   : > { %954 = vst [vmem:[#allocation2 + $0x18] sm:$0xff] %v938_v52  ;;  %962 = vst [vmem:[#allocation2 + $0x38] sm:$0xff] %v946_v53  ;;  %v936_v58 = vadd.f32 %v875_v54, %v751_v50  ;;  %v944_v59 = vadd.f32 %v907_v55, %v759_v51 }
 0x29f   : > { %v1363_v60 = vpop.f32.mrf.mxu0  ;;  %v1371_v61 = vpop.f32.mrf.mxu1 }
 0x2a0   : > { %952 = vst [vmem:[#allocation2] sm:$0xff] %v936_v58  ;;  %960 = vst [vmem:[#allocation2 + $0x20] sm:$0xff] %v944_v59  ;;  %v941_v0 = vadd.f32 %v1363_v60, %v756_v56  ;;  %v949_v1 = vadd.f32 %v1371_v61, %v764_v57 }
 0x2a1   : > { %v888_v2 = vpop.f32.mrf.mxu0  ;;  %v920_v3 = vpop.f32.mrf.mxu1 }
 0x2a2   : > { %957 = vst [vmem:[#allocation2 + $0x8] sm:$0xff] %v941_v0  ;;  %965 = vst [vmem:[#allocation2 + $0x78] sm:$0xff] %v949_v1  ;;  %v939_v6 = vadd.f32 %v888_v2, %v754_v62  ;;  %v947_v7 = vadd.f32 %v920_v3, %v762_v63 }
 0x2a3   : > { %v1364_v8 = vpop.f32.mrf.mxu0  ;;  %v1372_v9 = vpop.f32.mrf.mxu1 }
 0x2a4   : > { %955 = vst [vmem:[#allocation2 + $0x50] sm:$0xff] %v939_v6  ;;  %963 = vst [vmem:[#allocation2 + $0x60] sm:$0xff] %v947_v7  ;;  %v942_v13 = vadd.f32 %v1364_v8, %v757_v4  ;;  %v950_v16 = vadd.f32 %v1372_v9, %v765_v5  ;;  %970 = sbr.rel (%p1152_p6) target bundleno = 690 (0x2b2), region = 52 }
 0x2a5   : > { %v891_v14 = vpop.f32.mrf.mxu0  ;;  %v923_v15 = vpop.f32.mrf.mxu1 }
 0x2a6   : > { %958 = vst [vmem:[#allocation2 + $0x48] sm:$0xff] %v942_v13  ;;  %966 = vst [vmem:[#allocation2 + $0x28] sm:$0xff] %v950_v16  ;;  %v940_v17 = vadd.f32 %v891_v14, %v755_v10  ;;  %v948_v18 = vadd.f32 %v923_v15, %v763_v11 }
 0x2a8   : > { %956 = vst [vmem:[#allocation2 + $0x68] sm:$0xff] %v940_v17  ;;  %964 = vst [vmem:[#allocation2 + $0x70] sm:$0xff] %v948_v18 }
 0x2a9   : > { %v971_v19 = vld [vmem:[#allocation2 + $0x30] sm:$0xff]  ;;  %v972_v20 = vld [vmem:[#allocation2] sm:$0xff]  ;;  %v973_v21 = vld [vmem:[#allocation2 + $0x58] sm:$0xff] }
 0x2aa   : > { %987 = vst [vmem:[%s1823_s6] sm:$0xff] %v971_v19  ;;  %988 = vst [vmem:[%s1823_s6 + $0x8] sm:$0xff] %v972_v20  ;;  %v974_v22 = vld [vmem:[#allocation2 + $0x18] sm:$0xff]  ;;  %v977_v24 = vld [vmem:[#allocation2 + $0x8] sm:$0xff] }
 0x2ab   : > { %989 = vst [vmem:[%s1823_s6 + $0x10] sm:$0xff] %v973_v21  ;;  %v975_v12 = vld [vmem:[#allocation2 + $0x50] sm:$0xff]  ;;  %990 = vst [vmem:[%s1823_s6 + $0x18] sm:$0xff] %v974_v22  ;;  %v979_v31 = vld [vmem:[#allocation2 + $0x40] sm:$0xff] }
 0x2ac   : > { %991 = vst [vmem:[%s1823_s6 + $0x20] sm:$0xff] %v975_v12  ;;  %993 = vst [vmem:[%s1823_s6 + $0x30] sm:$0xff] %v977_v24  ;;  %v980_v26 = vld [vmem:[#allocation2 + $0x20] sm:$0xff]  ;;  %v981_v48 = vld [vmem:[#allocation2 + $0x10] sm:$0xff] }
 0x2ad   : > { %v978_v25 = vld [vmem:[#allocation2 + $0x48] sm:$0xff]  ;;  %995 = vst [vmem:[%s1823_s6 + $0x40] sm:$0xff] %v979_v31  ;;  %v982_v27 = vld [vmem:[#allocation2 + $0x38] sm:$0xff]  ;;  %996 = vst [vmem:[%s1823_s6 + $0x48] sm:$0xff] %v980_v26 }
 0x2ae   : > { %994 = vst [vmem:[%s1823_s6 + $0x38] sm:$0xff] %v978_v25  ;;  %997 = vst [vmem:[%s1823_s6 + $0x50] sm:$0xff] %v981_v48  ;;  %v983_v28 = vld [vmem:[#allocation2 + $0x60] sm:$0xff]  ;;  %v985_v33 = vld [vmem:[#allocation2 + $0x78] sm:$0xff] }
 0x2af   : > { %v976_v23 = vld [vmem:[#allocation2 + $0x68] sm:$0xff]  ;;  %998 = vst [vmem:[%s1823_s6 + $0x58] sm:$0xff] %v982_v27  ;;  %v984_v32 = vld [vmem:[#allocation2 + $0x70] sm:$0xff]  ;;  %999 = vst [vmem:[%s1823_s6 + $0x60] sm:$0xff] %v983_v28 }
 0x2b0   : > { %992 = vst [vmem:[%s1823_s6 + $0x28] sm:$0xff] %v976_v23  ;;  %1000 = vst [vmem:[%s1823_s6 + $0x68] sm:$0xff] %v984_v32  ;;  %v986_v34 = vld [vmem:[#allocation2 + $0x28] sm:$0xff] }
 0x2b1   : > { %1001 = vst [vmem:[%s1823_s6 + $0x70] sm:$0xff] %v985_v33  ;;  %1002 = vst [vmem:[%s1823_s6 + $0x78] sm:$0xff] %v986_v34 }
 0x2b2 PF: > { %s16_s23 = sadd.s32 1, %s1483_s23   ;;  %s1824_s21 = smov %s1479_s22 }
 0x2b3   : > { %p13_p7 = scmp.ge.s32.totalorder %s16_s23, 6   ;;  %s1825_s22 = smov %s1827_s24 }
 0x2b5   :  { %15 = sbr.rel (!%p13_p7) target bundleno = 2 (0x2), region = 88 }

</bundles_post_ra>
